<compile_context>
chip_gen: v6e
topology: v6e:2x2x1
jax: 0.10.0
libtpu: 0.0.40
codegen_flags: <defaults>
</compile_context>

<pallas_src>
import math

import jax
import jax.numpy as jnp
from jax.experimental import pallas as pl
from jax.experimental.pallas import tpu as pltpu


# ----------------------------------------------------------------------------
# Pallas kernel: full _MRNN forward (training=True)
# ----------------------------------------------------------------------------
def _mrnn_kernel(
    # packed sequence inputs
    xmdf_ref,   # [T*B, 3F] bf16  (forward  cat([x, m, d], -1), t-major rows)
    xmdb_ref,   # [T*B, 3F] bf16  (backward cat([x, m, d], -1), t-major rows)
    xs_ref,     # [T*B, F]  f32   (forward X, t-major rows)
    ms_ref,     # [T*B, F]  f32   (forward mask, t-major rows)
    sel_ref,    # [T, T*B]  f32   (segment-sum selection matrix)
    # forward GRUCell params (packed)
    wi_f_ref,   # [3F, 3H] bf16   rows: [x;m;d] parts, cols: [r|z|n] gates
    wh_f_ref,   # [H, 3H]  bf16   cols: [r|z|n]
    bi_f_ref,   # [1, 3H]  f32
    bh_f_ref,   # [1, 3H]  f32
    # backward GRUCell params (packed, same layout)
    wi_b_ref, wh_b_ref, bi_b_ref, bh_b_ref,
    # concated_hidden_project: Linear(2H -> F), packed [h_f; h_b] rows
    wp_ref,     # [2H, F]  bf16
    bp_ref,     # [1, F]   f32
    # FCN_Regression params: [U; V1; V2] stacked (already masked/transposed)
    uvw_ref,    # [3F, F]  bf16
    beta_ref,   # [1, F]   f32
    wfin_ref,   # [F, F]   bf16   (= final_linear.weight.T)
    bfin_ref,   # [1, F]   f32
    # outputs
    imputed_ref,  # [T*B, F] f32  (t-major rows; reshaped outside the kernel)
    loss_ref,     # [1, 1]   f32
):
    f32 = jnp.float32
    bf16 = jnp.bfloat16

    TB, F = xs_ref.shape
    H = wh_f_ref.shape[0]
    T = sel_ref.shape[0]
    B = TB // T

    # ---- hoisted input-side GRU matmuls: all T steps at once ---------------
    gi_f = jnp.dot(xmdf_ref[...], wi_f_ref[...],
                   preferred_element_type=f32) + bi_f_ref[...]   # [T*B, 3H]
    gi_b = jnp.dot(xmdb_ref[...], wi_b_ref[...],
                   preferred_element_type=f32) + bi_b_ref[...]   # [T*B, 3H]

    wh_f = wh_f_ref[...]
    wh_b = wh_b_ref[...]
    bh_f = bh_f_ref[...]
    bh_b = bh_b_ref[...]

    def gru_step(h, gi_t, wh, bh):
        # one fused hidden-side matmul per step; gates sliced from the lanes
        gh = jnp.dot(h.astype(bf16), wh, preferred_element_type=f32) + bh
        r = jax.nn.sigmoid(gi_t[:, 0:H] + gh[:, 0:H])
        z = jax.nn.sigmoid(gi_t[:, H:2 * H] + gh[:, H:2 * H])
        n = jnp.tanh(gi_t[:, 2 * H:3 * H] + r * gh[:, 2 * H:3 * H])
        return (1.0 - z) * n + z * h

    # ---- interleaved forward / backward recurrences -------------------------
    h_f = jnp.zeros((B, H), f32)
    h_b = jnp.zeros((B, H), f32)
    hs_f = []
    hs_b = []
    for t in range(T):
        h_f = gru_step(h_f, gi_f[t * B:(t + 1) * B, :], wh_f, bh_f)
        h_b = gru_step(h_b, gi_b[t * B:(t + 1) * B, :], wh_b, bh_b)
        hs_f.append(h_f)
        hs_b.append(h_b)
    hs_b = hs_b[::-1]   # matches hidden_states_b[::-1] in the torch code

    HF = jnp.concatenate(hs_f, axis=0)                    # [T*B, H]
    HB = jnp.concatenate(hs_b, axis=0)                    # [T*B, H]
    Hcat = jnp.concatenate([HF, HB], axis=1).astype(bf16)  # [T*B, 2H]

    Xs = xs_ref[...]
    Ms = ms_ref[...]

    # ---- batched post-GRU section -------------------------------------------
    # concated_hidden_project
    rnn_est = jnp.dot(Hcat, wp_ref[...],
                      preferred_element_type=f32) + bp_ref[...]   # [T*B, F]
    rnn_imp = Ms * Xs + (1.0 - Ms) * rnn_est

    # FCN_Regression(x, m, rnn_imp) — one fused [x | rnn_imp | m] matmul
    XRM = jnp.concatenate([Xs, rnn_imp, Ms], axis=1).astype(bf16)  # [T*B, 3F]
    h_t = jnp.tanh(jnp.dot(XRM, uvw_ref[...],
                           preferred_element_type=f32) + beta_ref[...])
    fcn_est = jnp.dot(h_t.astype(bf16), wfin_ref[...],
                      preferred_element_type=f32) + bfin_ref[...]  # [T*B, F]

    # ---- vectorized per-step masked RMSE (segment sums via one matmul each) --
    Sel = sel_ref[...]                               # [T, T*B]
    err_f = jnp.square(fcn_est - Xs) * Ms
    err_r = jnp.square(rnn_est - Xs) * Ms
    num_f = jnp.sum(jnp.dot(Sel, err_f, preferred_element_type=f32),
                    axis=1, keepdims=True)           # [T, 1]
    num_r = jnp.sum(jnp.dot(Sel, err_r, preferred_element_type=f32),
                    axis=1, keepdims=True)           # [T, 1]
    den = jnp.sum(jnp.dot(Sel, Ms, preferred_element_type=f32),
                  axis=1, keepdims=True) + 1e-12     # [T, 1]
    rmse_all = jnp.sqrt(num_f / den) + jnp.sqrt(num_r / den)   # [T, 1]
    loss_ref[...] = jnp.sum(rmse_all, axis=0, keepdims=True) / float(T)

    # ---- imputation: one lane-dense slab store -------------------------------
    imputed_ref[...] = Ms * Xs + (1.0 - Ms) * fcn_est


# ----------------------------------------------------------------------------
# Wrapper: packs weights/inputs into fused, lane-dense layouts and calls Pallas
# ----------------------------------------------------------------------------
def _pack_params(params):
    (f_wi, f_wh, f_bi, f_bh, b_wi, b_wh, b_bi, b_bh,
     wp, bp, u, v1, v2, beta, wfin, bfin) = params
    bf16 = jnp.bfloat16
    f32 = jnp.float32

    def pack_gru(wi, wh, bi, bh):
        # wi: [3(gate r,z,n), 3(part x,m,d), F, H] -> [3F, 3H]
        wi_packed = jnp.concatenate(
            [jnp.concatenate([wi[g, p] for p in range(3)], axis=0)
             for g in range(3)], axis=1)
        wh_packed = jnp.concatenate([wh[g] for g in range(3)], axis=1)   # [H, 3H]
        bi_packed = jnp.concatenate([bi[g] for g in range(3)], axis=1)   # [1, 3H]
        bh_packed = jnp.concatenate([bh[g] for g in range(3)], axis=1)   # [1, 3H]
        return (wi_packed.astype(bf16), wh_packed.astype(bf16),
                bi_packed.astype(f32), bh_packed.astype(f32))

    wi_f, wh_f, bi_f, bh_f = pack_gru(f_wi, f_wh, f_bi, f_bh)
    wi_b, wh_b, bi_b, bh_b = pack_gru(b_wi, b_wh, b_bi, b_bh)

    wp_packed = jnp.concatenate([wp[0], wp[1]], axis=0).astype(bf16)   # [2H, F]
    uvw_packed = jnp.concatenate([u, v1, v2], axis=0).astype(bf16)     # [3F, F]

    return (wi_f, wh_f, bi_f, bh_f, wi_b, wh_b, bi_b, bh_b,
            wp_packed, bp.astype(f32), uvw_packed, beta.astype(f32),
            wfin.astype(bf16), bfin.astype(f32))


def mrnn_forward(inputs, params):
    xf, mf, df = inputs["forward"]
    xb, mb, db = inputs["backward"]
    B, T, F = xf.shape

    def flat_tmajor(a):  # (B, T, C) -> (T*B, C), row index = t*B + b
        return jnp.transpose(a, (1, 0, 2)).reshape(T * B, a.shape[-1])

    xmdf = flat_tmajor(jnp.concatenate([xf, mf, df], axis=-1)).astype(jnp.bfloat16)
    xmdb = flat_tmajor(jnp.concatenate([xb, mb, db], axis=-1)).astype(jnp.bfloat16)
    xs = flat_tmajor(xf).astype(jnp.float32)
    ms = flat_tmajor(mf).astype(jnp.float32)
    # segment-sum selection matrix: Sel[t, t*B + b] = 1
    sel = jnp.repeat(jnp.eye(T, dtype=jnp.float32), B, axis=1)   # (T, T*B)

    packed = _pack_params(params)
    args = (xmdf, xmdb, xs, ms, sel) + packed

    vmem = pl.BlockSpec(memory_space=pltpu.MemorySpace.VMEM)
    imputed_flat, loss = pl.pallas_call(
        _mrnn_kernel,
        out_shape=(
            jax.ShapeDtypeStruct((T * B, F), jnp.float32),
            jax.ShapeDtypeStruct((1, 1), jnp.float32),
        ),
        in_specs=[vmem] * len(args),
        out_specs=(vmem, vmem),
    )(*args)

    imputed = jnp.transpose(imputed_flat.reshape(T, B, F), (1, 0, 2))
    return {"loss": loss[0, 0], "imputed_data": imputed}


# ----------------------------------------------------------------------------
# Pure-JAX reference (f32, unpacked params) for a sanity check
# ----------------------------------------------------------------------------
def mrnn_reference(inputs, params):
    (f_wi, f_wh, f_bi, f_bh, b_wi, b_wh, b_bi, b_bh,
     wp, bp, u, v1, v2, beta, wfin, bfin) = params
    xf, mf, df = inputs["forward"]
    xb, mb, db = inputs["backward"]
    B, T, F = xf.shape
    H = f_wh.shape[-1]

    def gru_pass(X, M, D, Wi, Wh, bi, bh):
        h = jnp.zeros((B, H), jnp.float32)
        hs = []
        for t in range(T):
            x, m, d = X[:, t, :], M[:, t, :], D[:, t, :]
            gi = lambda g: x @ Wi[g, 0] + m @ Wi[g, 1] + d @ Wi[g, 2] + bi[g]
            gh = lambda g: h @ Wh[g] + bh[g]
            r = jax.nn.sigmoid(gi(0) + gh(0))
            z = jax.nn.sigmoid(gi(1) + gh(1))
            n = jnp.tanh(gi(2) + r * gh(2))
            h = (1.0 - z) * n + z * h
            hs.append(h)
        return hs

    hs_f = gru_pass(xf, mf, df, f_wi, f_wh, f_bi, f_bh)
    hs_b = gru_pass(xb, mb, db, b_wi, b_wh, b_bi, b_bh)[::-1]

    def rmse(pred, target, mask):
        return jnp.sqrt(jnp.sum(jnp.square(pred - target) * mask) /
                        (jnp.sum(mask) + 1e-12))

    loss = 0.0
    ests = []
    for i in range(T):
        x, m = xf[:, i, :], mf[:, i, :]
        rnn_est = hs_f[i] @ wp[0] + hs_b[i] @ wp[1] + bp
        rnn_imp = m * x + (1.0 - m) * rnn_est
        h_t = jnp.tanh(x @ u + rnn_imp @ v1 + m @ v2 + beta)
        fcn_est = h_t @ wfin + bfin
        loss = loss + rmse(fcn_est, x, m) + rmse(rnn_est, x, m)
        ests.append(fcn_est[:, None, :])
    est = jnp.concatenate(ests, axis=1)
    imputed = mf * xf + (1.0 - mf) * est
    return {"loss": loss / T, "imputed_data": imputed}


# ----------------------------------------------------------------------------
# Deterministic synthetic parameters / inputs
# ----------------------------------------------------------------------------
def init_params(key, F, H):
    ks = jax.random.split(key, 20)
    sg = 1.0 / math.sqrt(H)       # GRUCell init range
    sp = 1.0 / math.sqrt(2 * H)   # Linear(2H, F) range
    sf = 1.0 / math.sqrt(F)       # FCN_Regression range

    u = lambda k, shape, s: jax.random.uniform(k, shape, jnp.float32, -s, s)

    f_wi = u(ks[0], (3, 3, F, H), sg)
    f_wh = u(ks[1], (3, H, H), sg)
    f_bi = u(ks[2], (3, 1, H), sg)
    f_bh = u(ks[3], (3, 1, H), sg)
    b_wi = u(ks[4], (3, 3, F, H), sg)
    b_wh = u(ks[5], (3, H, H), sg)
    b_bi = u(ks[6], (3, 1, H), sg)
    b_bh = u(ks[7], (3, 1, H), sg)

    wp = u(ks[8], (2, H, F), sp)
    bp = u(ks[9], (1, F), sp)

    # FCN_Regression: m buffer = ones(F,F) - eye(F); linear(x, W) == x @ W.T
    mmask = jnp.ones((F, F), jnp.float32) - jnp.eye(F, dtype=jnp.float32)
    U = u(ks[10], (F, F), sf)
    V1 = u(ks[11], (F, F), sf)
    V2 = u(ks[12], (F, F), sf)
    beta = u(ks[13], (1, F), sf)
    Wfin = u(ks[14], (F, F), sf)
    bfin = u(ks[15], (1, F), sf)

    u_packed = (U * mmask).T
    v1_packed = (V1 * mmask).T
    v2_packed = V2.T
    wfin_packed = Wfin.T

    return (f_wi, f_wh, f_bi, f_bh, b_wi, b_wh, b_bi, b_bh,
            wp, bp, u_packed, v1_packed, v2_packed, beta, wfin_packed, bfin)


def make_inputs(key, B, T, F):
    k1, k2, k3 = jax.random.split(key, 3)
    x = jax.random.normal(k1, (B, T, F), jnp.float32)
    mask = (jax.random.uniform(k2, (B, T, F)) < 0.7).astype(jnp.float32)
    delta = jax.random.uniform(k3, (B, T, F), jnp.float32, 0.0, 2.0)
    x = x * mask  # observed values only
    # backward direction = time-reversed sequences (as prepared by pypots DatasetForMRNN)
    xb, mb, db = x[:, ::-1, :], mask[:, ::-1, :], delta[:, ::-1, :]
    return {"forward": (x, mask, delta), "backward": (xb, mb, db)}


if __name__ == "__main__":
    B, T, F, H = 8, 8, 8, 32  # batch, seq_len, feature_num, rnn_hidden_size

    key = jax.random.PRNGKey(0)
    k_in, k_par = jax.random.split(key)
    inputs = make_inputs(k_in, B, T, F)
    params = init_params(k_par, F, H)

    out = mrnn_forward(inputs, params)
    jax.block_until_ready(out["imputed_data"])
    jax.block_until_ready(out["loss"])

    ref = mrnn_reference(inputs, params)
    assert out["imputed_data"].shape == (B, T, F)
    assert jnp.allclose(out["imputed_data"], ref["imputed_data"], atol=3e-2, rtol=3e-2)
    assert jnp.allclose(out["loss"], ref["loss"], atol=3e-2, rtol=3e-2)

    print("KERNEL_OK")
</pallas_src>

<mosaic_0001>
module attributes {stable_mosaic.version = 11 : i64} {
  func.func @_mrnn_kernel(%arg0: memref<64x24xbf16, #tpu.memory_space<vmem>>, %arg1: memref<64x24xbf16, #tpu.memory_space<vmem>>, %arg2: memref<64x8xf32, #tpu.memory_space<vmem>>, %arg3: memref<64x8xf32, #tpu.memory_space<vmem>>, %arg4: memref<8x64xf32, #tpu.memory_space<vmem>>, %arg5: memref<24x96xbf16, #tpu.memory_space<vmem>>, %arg6: memref<32x96xbf16, #tpu.memory_space<vmem>>, %arg7: memref<1x96xf32, #tpu.memory_space<vmem>>, %arg8: memref<1x96xf32, #tpu.memory_space<vmem>>, %arg9: memref<24x96xbf16, #tpu.memory_space<vmem>>, %arg10: memref<32x96xbf16, #tpu.memory_space<vmem>>, %arg11: memref<1x96xf32, #tpu.memory_space<vmem>>, %arg12: memref<1x96xf32, #tpu.memory_space<vmem>>, %arg13: memref<64x8xbf16, #tpu.memory_space<vmem>>, %arg14: memref<1x8xf32, #tpu.memory_space<vmem>>, %arg15: memref<24x8xbf16, #tpu.memory_space<vmem>>, %arg16: memref<1x8xf32, #tpu.memory_space<vmem>>, %arg17: memref<8x8xbf16, #tpu.memory_space<vmem>>, %arg18: memref<1x8xf32, #tpu.memory_space<vmem>>, %arg19: memref<64x8xf32, #tpu.memory_space<vmem>>, %arg20: memref<1x1xf32, #tpu.memory_space<vmem>>) attributes {dimension_semantics = [], scalar_prefetch = 0 : i64, scratch_operands = 0 : i64, tpu.core_type = #tpu.core_type<tc>} {
    %c0 = arith.constant 0 : index
    %c0_0 = arith.constant 0 : index
    %0 = vector.load %arg0[%c0, %c0_0] : memref<64x24xbf16, #tpu.memory_space<vmem>>, vector<64x24xbf16>
    %c0_1 = arith.constant 0 : index
    %c0_2 = arith.constant 0 : index
    %1 = vector.load %arg5[%c0_1, %c0_2] : memref<24x96xbf16, #tpu.memory_space<vmem>>, vector<24x96xbf16>
    %cst = arith.constant dense<0.000000e+00> : vector<64x96xf32>
    %2 = tpu.matmul %0, %1, %cst {dimension_numbers = #tpu.dot_dimension_numbers<[1], [0], [0], [1], [0, 0, 1, 1], [], []>} : vector<64x24xbf16>, vector<24x96xbf16>, vector<64x96xf32> -> vector<64x96xf32>
    %c0_3 = arith.constant 0 : index
    %c0_4 = arith.constant 0 : index
    %3 = vector.load %arg7[%c0_3, %c0_4] : memref<1x96xf32, #tpu.memory_space<vmem>>, vector<1x96xf32>
    %4 = vector.broadcast %3 : vector<1x96xf32> to vector<64x96xf32>
    %5 = arith.addf %2, %4 : vector<64x96xf32>
    %c0_5 = arith.constant 0 : index
    %c0_6 = arith.constant 0 : index
    %6 = vector.load %arg1[%c0_5, %c0_6] : memref<64x24xbf16, #tpu.memory_space<vmem>>, vector<64x24xbf16>
    %c0_7 = arith.constant 0 : index
    %c0_8 = arith.constant 0 : index
    %7 = vector.load %arg9[%c0_7, %c0_8] : memref<24x96xbf16, #tpu.memory_space<vmem>>, vector<24x96xbf16>
    %cst_9 = arith.constant dense<0.000000e+00> : vector<64x96xf32>
    %8 = tpu.matmul %6, %7, %cst_9 {dimension_numbers = #tpu.dot_dimension_numbers<[1], [0], [0], [1], [0, 0, 1, 1], [], []>} : vector<64x24xbf16>, vector<24x96xbf16>, vector<64x96xf32> -> vector<64x96xf32>
    %c0_10 = arith.constant 0 : index
    %c0_11 = arith.constant 0 : index
    %9 = vector.load %arg11[%c0_10, %c0_11] : memref<1x96xf32, #tpu.memory_space<vmem>>, vector<1x96xf32>
    %10 = vector.broadcast %9 : vector<1x96xf32> to vector<64x96xf32>
    %11 = arith.addf %8, %10 : vector<64x96xf32>
    %c0_12 = arith.constant 0 : index
    %c0_13 = arith.constant 0 : index
    %12 = vector.load %arg6[%c0_12, %c0_13] : memref<32x96xbf16, #tpu.memory_space<vmem>>, vector<32x96xbf16>
    %c0_14 = arith.constant 0 : index
    %c0_15 = arith.constant 0 : index
    %13 = vector.load %arg10[%c0_14, %c0_15] : memref<32x96xbf16, #tpu.memory_space<vmem>>, vector<32x96xbf16>
    %c0_16 = arith.constant 0 : index
    %c0_17 = arith.constant 0 : index
    %14 = vector.load %arg8[%c0_16, %c0_17] : memref<1x96xf32, #tpu.memory_space<vmem>>, vector<1x96xf32>
    %c0_18 = arith.constant 0 : index
    %c0_19 = arith.constant 0 : index
    %15 = vector.load %arg12[%c0_18, %c0_19] : memref<1x96xf32, #tpu.memory_space<vmem>>, vector<1x96xf32>
    %cst_20 = arith.constant 0.000000e+00 : f32
    %16 = vector.broadcast %cst_20 : f32 to vector<8x32xf32>
    %cst_21 = arith.constant 0.000000e+00 : f32
    %17 = vector.broadcast %cst_21 : f32 to vector<8x32xf32>
    %18 = vector.extract_strided_slice %5 {offsets = [0, 0], sizes = [8, 96], strides = [1, 1]} : vector<64x96xf32> to vector<8x96xf32>
    %19 = arith.truncf %16 : vector<8x32xf32> to vector<8x32xbf16>
    %cst_22 = arith.constant dense<0.000000e+00> : vector<8x96xf32>
    %20 = tpu.matmul %19, %12, %cst_22 {dimension_numbers = #tpu.dot_dimension_numbers<[1], [0], [0], [1], [0, 0, 1, 1], [], []>} : vector<8x32xbf16>, vector<32x96xbf16>, vector<8x96xf32> -> vector<8x96xf32>
    %21 = vector.broadcast %14 : vector<1x96xf32> to vector<8x96xf32>
    %22 = arith.addf %20, %21 : vector<8x96xf32>
    %23 = vector.extract_strided_slice %18 {offsets = [0, 0], sizes = [8, 32], strides = [1, 1]} : vector<8x96xf32> to vector<8x32xf32>
    %24 = vector.extract_strided_slice %22 {offsets = [0, 0], sizes = [8, 32], strides = [1, 1]} : vector<8x96xf32> to vector<8x32xf32>
    %25 = arith.addf %23, %24 : vector<8x32xf32>
    %26 = arith.negf %25 : vector<8x32xf32>
    %27 = math.exp %26 : vector<8x32xf32>
    %cst_23 = arith.constant 1.000000e+00 : f32
    %28 = vector.broadcast %cst_23 : f32 to vector<8x32xf32>
    %29 = arith.addf %28, %27 : vector<8x32xf32>
    %30 = arith.divf %28, %29 : vector<8x32xf32>
    %31 = vector.extract_strided_slice %18 {offsets = [0, 32], sizes = [8, 32], strides = [1, 1]} : vector<8x96xf32> to vector<8x32xf32>
    %32 = vector.extract_strided_slice %22 {offsets = [0, 32], sizes = [8, 32], strides = [1, 1]} : vector<8x96xf32> to vector<8x32xf32>
    %33 = arith.addf %31, %32 : vector<8x32xf32>
    %34 = arith.negf %33 : vector<8x32xf32>
    %35 = math.exp %34 : vector<8x32xf32>
    %cst_24 = arith.constant 1.000000e+00 : f32
    %36 = vector.broadcast %cst_24 : f32 to vector<8x32xf32>
    %37 = arith.addf %36, %35 : vector<8x32xf32>
    %38 = arith.divf %36, %37 : vector<8x32xf32>
    %39 = vector.extract_strided_slice %18 {offsets = [0, 64], sizes = [8, 32], strides = [1, 1]} : vector<8x96xf32> to vector<8x32xf32>
    %40 = vector.extract_strided_slice %22 {offsets = [0, 64], sizes = [8, 32], strides = [1, 1]} : vector<8x96xf32> to vector<8x32xf32>
    %41 = arith.mulf %30, %40 : vector<8x32xf32>
    %42 = arith.addf %39, %41 : vector<8x32xf32>
    %43 = math.tanh %42 : vector<8x32xf32>
    %cst_25 = arith.constant 1.000000e+00 : f32
    %44 = vector.broadcast %cst_25 : f32 to vector<8x32xf32>
    %45 = arith.subf %44, %38 : vector<8x32xf32>
    %46 = arith.mulf %45, %43 : vector<8x32xf32>
    %47 = arith.mulf %38, %16 : vector<8x32xf32>
    %48 = arith.addf %46, %47 : vector<8x32xf32>
    %49 = vector.extract_strided_slice %11 {offsets = [0, 0], sizes = [8, 96], strides = [1, 1]} : vector<64x96xf32> to vector<8x96xf32>
    %50 = arith.truncf %17 : vector<8x32xf32> to vector<8x32xbf16>
    %cst_26 = arith.constant dense<0.000000e+00> : vector<8x96xf32>
    %51 = tpu.matmul %50, %13, %cst_26 {dimension_numbers = #tpu.dot_dimension_numbers<[1], [0], [0], [1], [0, 0, 1, 1], [], []>} : vector<8x32xbf16>, vector<32x96xbf16>, vector<8x96xf32> -> vector<8x96xf32>
    %52 = vector.broadcast %15 : vector<1x96xf32> to vector<8x96xf32>
    %53 = arith.addf %51, %52 : vector<8x96xf32>
    %54 = vector.extract_strided_slice %49 {offsets = [0, 0], sizes = [8, 32], strides = [1, 1]} : vector<8x96xf32> to vector<8x32xf32>
    %55 = vector.extract_strided_slice %53 {offsets = [0, 0], sizes = [8, 32], strides = [1, 1]} : vector<8x96xf32> to vector<8x32xf32>
    %56 = arith.addf %54, %55 : vector<8x32xf32>
    %57 = arith.negf %56 : vector<8x32xf32>
    %58 = math.exp %57 : vector<8x32xf32>
    %cst_27 = arith.constant 1.000000e+00 : f32
    %59 = vector.broadcast %cst_27 : f32 to vector<8x32xf32>
    %60 = arith.addf %59, %58 : vector<8x32xf32>
    %61 = arith.divf %59, %60 : vector<8x32xf32>
    %62 = vector.extract_strided_slice %49 {offsets = [0, 32], sizes = [8, 32], strides = [1, 1]} : vector<8x96xf32> to vector<8x32xf32>
    %63 = vector.extract_strided_slice %53 {offsets = [0, 32], sizes = [8, 32], strides = [1, 1]} : vector<8x96xf32> to vector<8x32xf32>
    %64 = arith.addf %62, %63 : vector<8x32xf32>
    %65 = arith.negf %64 : vector<8x32xf32>
    %66 = math.exp %65 : vector<8x32xf32>
    %cst_28 = arith.constant 1.000000e+00 : f32
    %67 = vector.broadcast %cst_28 : f32 to vector<8x32xf32>
    %68 = arith.addf %67, %66 : vector<8x32xf32>
    %69 = arith.divf %67, %68 : vector<8x32xf32>
    %70 = vector.extract_strided_slice %49 {offsets = [0, 64], sizes = [8, 32], strides = [1, 1]} : vector<8x96xf32> to vector<8x32xf32>
    %71 = vector.extract_strided_slice %53 {offsets = [0, 64], sizes = [8, 32], strides = [1, 1]} : vector<8x96xf32> to vector<8x32xf32>
    %72 = arith.mulf %61, %71 : vector<8x32xf32>
    %73 = arith.addf %70, %72 : vector<8x32xf32>
    %74 = math.tanh %73 : vector<8x32xf32>
    %cst_29 = arith.constant 1.000000e+00 : f32
    %75 = vector.broadcast %cst_29 : f32 to vector<8x32xf32>
    %76 = arith.subf %75, %69 : vector<8x32xf32>
    %77 = arith.mulf %76, %74 : vector<8x32xf32>
    %78 = arith.mulf %69, %17 : vector<8x32xf32>
    %79 = arith.addf %77, %78 : vector<8x32xf32>
    %80 = vector.extract_strided_slice %5 {offsets = [8, 0], sizes = [8, 96], strides = [1, 1]} : vector<64x96xf32> to vector<8x96xf32>
    %81 = arith.truncf %48 : vector<8x32xf32> to vector<8x32xbf16>
    %cst_30 = arith.constant dense<0.000000e+00> : vector<8x96xf32>
    %82 = tpu.matmul %81, %12, %cst_30 {dimension_numbers = #tpu.dot_dimension_numbers<[1], [0], [0], [1], [0, 0, 1, 1], [], []>} : vector<8x32xbf16>, vector<32x96xbf16>, vector<8x96xf32> -> vector<8x96xf32>
    %83 = vector.broadcast %14 : vector<1x96xf32> to vector<8x96xf32>
    %84 = arith.addf %82, %83 : vector<8x96xf32>
    %85 = vector.extract_strided_slice %80 {offsets = [0, 0], sizes = [8, 32], strides = [1, 1]} : vector<8x96xf32> to vector<8x32xf32>
    %86 = vector.extract_strided_slice %84 {offsets = [0, 0], sizes = [8, 32], strides = [1, 1]} : vector<8x96xf32> to vector<8x32xf32>
    %87 = arith.addf %85, %86 : vector<8x32xf32>
    %88 = arith.negf %87 : vector<8x32xf32>
    %89 = math.exp %88 : vector<8x32xf32>
    %cst_31 = arith.constant 1.000000e+00 : f32
    %90 = vector.broadcast %cst_31 : f32 to vector<8x32xf32>
    %91 = arith.addf %90, %89 : vector<8x32xf32>
    %92 = arith.divf %90, %91 : vector<8x32xf32>
    %93 = vector.extract_strided_slice %80 {offsets = [0, 32], sizes = [8, 32], strides = [1, 1]} : vector<8x96xf32> to vector<8x32xf32>
    %94 = vector.extract_strided_slice %84 {offsets = [0, 32], sizes = [8, 32], strides = [1, 1]} : vector<8x96xf32> to vector<8x32xf32>
    %95 = arith.addf %93, %94 : vector<8x32xf32>
    %96 = arith.negf %95 : vector<8x32xf32>
    %97 = math.exp %96 : vector<8x32xf32>
    %cst_32 = arith.constant 1.000000e+00 : f32
    %98 = vector.broadcast %cst_32 : f32 to vector<8x32xf32>
    %99 = arith.addf %98, %97 : vector<8x32xf32>
    %100 = arith.divf %98, %99 : vector<8x32xf32>
    %101 = vector.extract_strided_slice %80 {offsets = [0, 64], sizes = [8, 32], strides = [1, 1]} : vector<8x96xf32> to vector<8x32xf32>
    %102 = vector.extract_strided_slice %84 {offsets = [0, 64], sizes = [8, 32], strides = [1, 1]} : vector<8x96xf32> to vector<8x32xf32>
    %103 = arith.mulf %92, %102 : vector<8x32xf32>
    %104 = arith.addf %101, %103 : vector<8x32xf32>
    %105 = math.tanh %104 : vector<8x32xf32>
    %cst_33 = arith.constant 1.000000e+00 : f32
    %106 = vector.broadcast %cst_33 : f32 to vector<8x32xf32>
    %107 = arith.subf %106, %100 : vector<8x32xf32>
    %108 = arith.mulf %107, %105 : vector<8x32xf32>
    %109 = arith.mulf %100, %48 : vector<8x32xf32>
    %110 = arith.addf %108, %109 : vector<8x32xf32>
    %111 = vector.extract_strided_slice %11 {offsets = [8, 0], sizes = [8, 96], strides = [1, 1]} : vector<64x96xf32> to vector<8x96xf32>
    %112 = arith.truncf %79 : vector<8x32xf32> to vector<8x32xbf16>
    %cst_34 = arith.constant dense<0.000000e+00> : vector<8x96xf32>
    %113 = tpu.matmul %112, %13, %cst_34 {dimension_numbers = #tpu.dot_dimension_numbers<[1], [0], [0], [1], [0, 0, 1, 1], [], []>} : vector<8x32xbf16>, vector<32x96xbf16>, vector<8x96xf32> -> vector<8x96xf32>
    %114 = vector.broadcast %15 : vector<1x96xf32> to vector<8x96xf32>
    %115 = arith.addf %113, %114 : vector<8x96xf32>
    %116 = vector.extract_strided_slice %111 {offsets = [0, 0], sizes = [8, 32], strides = [1, 1]} : vector<8x96xf32> to vector<8x32xf32>
    %117 = vector.extract_strided_slice %115 {offsets = [0, 0], sizes = [8, 32], strides = [1, 1]} : vector<8x96xf32> to vector<8x32xf32>
    %118 = arith.addf %116, %117 : vector<8x32xf32>
    %119 = arith.negf %118 : vector<8x32xf32>
    %120 = math.exp %119 : vector<8x32xf32>
    %cst_35 = arith.constant 1.000000e+00 : f32
    %121 = vector.broadcast %cst_35 : f32 to vector<8x32xf32>
    %122 = arith.addf %121, %120 : vector<8x32xf32>
    %123 = arith.divf %121, %122 : vector<8x32xf32>
    %124 = vector.extract_strided_slice %111 {offsets = [0, 32], sizes = [8, 32], strides = [1, 1]} : vector<8x96xf32> to vector<8x32xf32>
    %125 = vector.extract_strided_slice %115 {offsets = [0, 32], sizes = [8, 32], strides = [1, 1]} : vector<8x96xf32> to vector<8x32xf32>
    %126 = arith.addf %124, %125 : vector<8x32xf32>
    %127 = arith.negf %126 : vector<8x32xf32>
    %128 = math.exp %127 : vector<8x32xf32>
    %cst_36 = arith.constant 1.000000e+00 : f32
    %129 = vector.broadcast %cst_36 : f32 to vector<8x32xf32>
    %130 = arith.addf %129, %128 : vector<8x32xf32>
    %131 = arith.divf %129, %130 : vector<8x32xf32>
    %132 = vector.extract_strided_slice %111 {offsets = [0, 64], sizes = [8, 32], strides = [1, 1]} : vector<8x96xf32> to vector<8x32xf32>
    %133 = vector.extract_strided_slice %115 {offsets = [0, 64], sizes = [8, 32], strides = [1, 1]} : vector<8x96xf32> to vector<8x32xf32>
    %134 = arith.mulf %123, %133 : vector<8x32xf32>
    %135 = arith.addf %132, %134 : vector<8x32xf32>
    %136 = math.tanh %135 : vector<8x32xf32>
    %cst_37 = arith.constant 1.000000e+00 : f32
    %137 = vector.broadcast %cst_37 : f32 to vector<8x32xf32>
    %138 = arith.subf %137, %131 : vector<8x32xf32>
    %139 = arith.mulf %138, %136 : vector<8x32xf32>
    %140 = arith.mulf %131, %79 : vector<8x32xf32>
    %141 = arith.addf %139, %140 : vector<8x32xf32>
    %142 = vector.extract_strided_slice %5 {offsets = [16, 0], sizes = [8, 96], strides = [1, 1]} : vector<64x96xf32> to vector<8x96xf32>
    %143 = arith.truncf %110 : vector<8x32xf32> to vector<8x32xbf16>
    %cst_38 = arith.constant dense<0.000000e+00> : vector<8x96xf32>
    %144 = tpu.matmul %143, %12, %cst_38 {dimension_numbers = #tpu.dot_dimension_numbers<[1], [0], [0], [1], [0, 0, 1, 1], [], []>} : vector<8x32xbf16>, vector<32x96xbf16>, vector<8x96xf32> -> vector<8x96xf32>
    %145 = vector.broadcast %14 : vector<1x96xf32> to vector<8x96xf32>
    %146 = arith.addf %144, %145 : vector<8x96xf32>
    %147 = vector.extract_strided_slice %142 {offsets = [0, 0], sizes = [8, 32], strides = [1, 1]} : vector<8x96xf32> to vector<8x32xf32>
    %148 = vector.extract_strided_slice %146 {offsets = [0, 0], sizes = [8, 32], strides = [1, 1]} : vector<8x96xf32> to vector<8x32xf32>
    %149 = arith.addf %147, %148 : vector<8x32xf32>
    %150 = arith.negf %149 : vector<8x32xf32>
    %151 = math.exp %150 : vector<8x32xf32>
    %cst_39 = arith.constant 1.000000e+00 : f32
    %152 = vector.broadcast %cst_39 : f32 to vector<8x32xf32>
    %153 = arith.addf %152, %151 : vector<8x32xf32>
    %154 = arith.divf %152, %153 : vector<8x32xf32>
    %155 = vector.extract_strided_slice %142 {offsets = [0, 32], sizes = [8, 32], strides = [1, 1]} : vector<8x96xf32> to vector<8x32xf32>
    %156 = vector.extract_strided_slice %146 {offsets = [0, 32], sizes = [8, 32], strides = [1, 1]} : vector<8x96xf32> to vector<8x32xf32>
    %157 = arith.addf %155, %156 : vector<8x32xf32>
    %158 = arith.negf %157 : vector<8x32xf32>
    %159 = math.exp %158 : vector<8x32xf32>
    %cst_40 = arith.constant 1.000000e+00 : f32
    %160 = vector.broadcast %cst_40 : f32 to vector<8x32xf32>
    %161 = arith.addf %160, %159 : vector<8x32xf32>
    %162 = arith.divf %160, %161 : vector<8x32xf32>
    %163 = vector.extract_strided_slice %142 {offsets = [0, 64], sizes = [8, 32], strides = [1, 1]} : vector<8x96xf32> to vector<8x32xf32>
    %164 = vector.extract_strided_slice %146 {offsets = [0, 64], sizes = [8, 32], strides = [1, 1]} : vector<8x96xf32> to vector<8x32xf32>
    %165 = arith.mulf %154, %164 : vector<8x32xf32>
    %166 = arith.addf %163, %165 : vector<8x32xf32>
    %167 = math.tanh %166 : vector<8x32xf32>
    %cst_41 = arith.constant 1.000000e+00 : f32
    %168 = vector.broadcast %cst_41 : f32 to vector<8x32xf32>
    %169 = arith.subf %168, %162 : vector<8x32xf32>
    %170 = arith.mulf %169, %167 : vector<8x32xf32>
    %171 = arith.mulf %162, %110 : vector<8x32xf32>
    %172 = arith.addf %170, %171 : vector<8x32xf32>
    %173 = vector.extract_strided_slice %11 {offsets = [16, 0], sizes = [8, 96], strides = [1, 1]} : vector<64x96xf32> to vector<8x96xf32>
    %174 = arith.truncf %141 : vector<8x32xf32> to vector<8x32xbf16>
    %cst_42 = arith.constant dense<0.000000e+00> : vector<8x96xf32>
    %175 = tpu.matmul %174, %13, %cst_42 {dimension_numbers = #tpu.dot_dimension_numbers<[1], [0], [0], [1], [0, 0, 1, 1], [], []>} : vector<8x32xbf16>, vector<32x96xbf16>, vector<8x96xf32> -> vector<8x96xf32>
    %176 = vector.broadcast %15 : vector<1x96xf32> to vector<8x96xf32>
    %177 = arith.addf %175, %176 : vector<8x96xf32>
    %178 = vector.extract_strided_slice %173 {offsets = [0, 0], sizes = [8, 32], strides = [1, 1]} : vector<8x96xf32> to vector<8x32xf32>
    %179 = vector.extract_strided_slice %177 {offsets = [0, 0], sizes = [8, 32], strides = [1, 1]} : vector<8x96xf32> to vector<8x32xf32>
    %180 = arith.addf %178, %179 : vector<8x32xf32>
    %181 = arith.negf %180 : vector<8x32xf32>
    %182 = math.exp %181 : vector<8x32xf32>
    %cst_43 = arith.constant 1.000000e+00 : f32
    %183 = vector.broadcast %cst_43 : f32 to vector<8x32xf32>
    %184 = arith.addf %183, %182 : vector<8x32xf32>
    %185 = arith.divf %183, %184 : vector<8x32xf32>
    %186 = vector.extract_strided_slice %173 {offsets = [0, 32], sizes = [8, 32], strides = [1, 1]} : vector<8x96xf32> to vector<8x32xf32>
    %187 = vector.extract_strided_slice %177 {offsets = [0, 32], sizes = [8, 32], strides = [1, 1]} : vector<8x96xf32> to vector<8x32xf32>
    %188 = arith.addf %186, %187 : vector<8x32xf32>
    %189 = arith.negf %188 : vector<8x32xf32>
    %190 = math.exp %189 : vector<8x32xf32>
    %cst_44 = arith.constant 1.000000e+00 : f32
    %191 = vector.broadcast %cst_44 : f32 to vector<8x32xf32>
    %192 = arith.addf %191, %190 : vector<8x32xf32>
    %193 = arith.divf %191, %192 : vector<8x32xf32>
    %194 = vector.extract_strided_slice %173 {offsets = [0, 64], sizes = [8, 32], strides = [1, 1]} : vector<8x96xf32> to vector<8x32xf32>
    %195 = vector.extract_strided_slice %177 {offsets = [0, 64], sizes = [8, 32], strides = [1, 1]} : vector<8x96xf32> to vector<8x32xf32>
    %196 = arith.mulf %185, %195 : vector<8x32xf32>
    %197 = arith.addf %194, %196 : vector<8x32xf32>
    %198 = math.tanh %197 : vector<8x32xf32>
    %cst_45 = arith.constant 1.000000e+00 : f32
    %199 = vector.broadcast %cst_45 : f32 to vector<8x32xf32>
    %200 = arith.subf %199, %193 : vector<8x32xf32>
    %201 = arith.mulf %200, %198 : vector<8x32xf32>
    %202 = arith.mulf %193, %141 : vector<8x32xf32>
    %203 = arith.addf %201, %202 : vector<8x32xf32>
    %204 = vector.extract_strided_slice %5 {offsets = [24, 0], sizes = [8, 96], strides = [1, 1]} : vector<64x96xf32> to vector<8x96xf32>
    %205 = arith.truncf %172 : vector<8x32xf32> to vector<8x32xbf16>
    %cst_46 = arith.constant dense<0.000000e+00> : vector<8x96xf32>
    %206 = tpu.matmul %205, %12, %cst_46 {dimension_numbers = #tpu.dot_dimension_numbers<[1], [0], [0], [1], [0, 0, 1, 1], [], []>} : vector<8x32xbf16>, vector<32x96xbf16>, vector<8x96xf32> -> vector<8x96xf32>
    %207 = vector.broadcast %14 : vector<1x96xf32> to vector<8x96xf32>
    %208 = arith.addf %206, %207 : vector<8x96xf32>
    %209 = vector.extract_strided_slice %204 {offsets = [0, 0], sizes = [8, 32], strides = [1, 1]} : vector<8x96xf32> to vector<8x32xf32>
    %210 = vector.extract_strided_slice %208 {offsets = [0, 0], sizes = [8, 32], strides = [1, 1]} : vector<8x96xf32> to vector<8x32xf32>
    %211 = arith.addf %209, %210 : vector<8x32xf32>
    %212 = arith.negf %211 : vector<8x32xf32>
    %213 = math.exp %212 : vector<8x32xf32>
    %cst_47 = arith.constant 1.000000e+00 : f32
    %214 = vector.broadcast %cst_47 : f32 to vector<8x32xf32>
    %215 = arith.addf %214, %213 : vector<8x32xf32>
    %216 = arith.divf %214, %215 : vector<8x32xf32>
    %217 = vector.extract_strided_slice %204 {offsets = [0, 32], sizes = [8, 32], strides = [1, 1]} : vector<8x96xf32> to vector<8x32xf32>
    %218 = vector.extract_strided_slice %208 {offsets = [0, 32], sizes = [8, 32], strides = [1, 1]} : vector<8x96xf32> to vector<8x32xf32>
    %219 = arith.addf %217, %218 : vector<8x32xf32>
    %220 = arith.negf %219 : vector<8x32xf32>
    %221 = math.exp %220 : vector<8x32xf32>
    %cst_48 = arith.constant 1.000000e+00 : f32
    %222 = vector.broadcast %cst_48 : f32 to vector<8x32xf32>
    %223 = arith.addf %222, %221 : vector<8x32xf32>
    %224 = arith.divf %222, %223 : vector<8x32xf32>
    %225 = vector.extract_strided_slice %204 {offsets = [0, 64], sizes = [8, 32], strides = [1, 1]} : vector<8x96xf32> to vector<8x32xf32>
    %226 = vector.extract_strided_slice %208 {offsets = [0, 64], sizes = [8, 32], strides = [1, 1]} : vector<8x96xf32> to vector<8x32xf32>
    %227 = arith.mulf %216, %226 : vector<8x32xf32>
    %228 = arith.addf %225, %227 : vector<8x32xf32>
    %229 = math.tanh %228 : vector<8x32xf32>
    %cst_49 = arith.constant 1.000000e+00 : f32
    %230 = vector.broadcast %cst_49 : f32 to vector<8x32xf32>
    %231 = arith.subf %230, %224 : vector<8x32xf32>
    %232 = arith.mulf %231, %229 : vector<8x32xf32>
    %233 = arith.mulf %224, %172 : vector<8x32xf32>
    %234 = arith.addf %232, %233 : vector<8x32xf32>
    %235 = vector.extract_strided_slice %11 {offsets = [24, 0], sizes = [8, 96], strides = [1, 1]} : vector<64x96xf32> to vector<8x96xf32>
    %236 = arith.truncf %203 : vector<8x32xf32> to vector<8x32xbf16>
    %cst_50 = arith.constant dense<0.000000e+00> : vector<8x96xf32>
    %237 = tpu.matmul %236, %13, %cst_50 {dimension_numbers = #tpu.dot_dimension_numbers<[1], [0], [0], [1], [0, 0, 1, 1], [], []>} : vector<8x32xbf16>, vector<32x96xbf16>, vector<8x96xf32> -> vector<8x96xf32>
    %238 = vector.broadcast %15 : vector<1x96xf32> to vector<8x96xf32>
    %239 = arith.addf %237, %238 : vector<8x96xf32>
    %240 = vector.extract_strided_slice %235 {offsets = [0, 0], sizes = [8, 32], strides = [1, 1]} : vector<8x96xf32> to vector<8x32xf32>
    %241 = vector.extract_strided_slice %239 {offsets = [0, 0], sizes = [8, 32], strides = [1, 1]} : vector<8x96xf32> to vector<8x32xf32>
    %242 = arith.addf %240, %241 : vector<8x32xf32>
    %243 = arith.negf %242 : vector<8x32xf32>
    %244 = math.exp %243 : vector<8x32xf32>
    %cst_51 = arith.constant 1.000000e+00 : f32
    %245 = vector.broadcast %cst_51 : f32 to vector<8x32xf32>
    %246 = arith.addf %245, %244 : vector<8x32xf32>
    %247 = arith.divf %245, %246 : vector<8x32xf32>
    %248 = vector.extract_strided_slice %235 {offsets = [0, 32], sizes = [8, 32], strides = [1, 1]} : vector<8x96xf32> to vector<8x32xf32>
    %249 = vector.extract_strided_slice %239 {offsets = [0, 32], sizes = [8, 32], strides = [1, 1]} : vector<8x96xf32> to vector<8x32xf32>
    %250 = arith.addf %248, %249 : vector<8x32xf32>
    %251 = arith.negf %250 : vector<8x32xf32>
    %252 = math.exp %251 : vector<8x32xf32>
    %cst_52 = arith.constant 1.000000e+00 : f32
    %253 = vector.broadcast %cst_52 : f32 to vector<8x32xf32>
    %254 = arith.addf %253, %252 : vector<8x32xf32>
    %255 = arith.divf %253, %254 : vector<8x32xf32>
    %256 = vector.extract_strided_slice %235 {offsets = [0, 64], sizes = [8, 32], strides = [1, 1]} : vector<8x96xf32> to vector<8x32xf32>
    %257 = vector.extract_strided_slice %239 {offsets = [0, 64], sizes = [8, 32], strides = [1, 1]} : vector<8x96xf32> to vector<8x32xf32>
    %258 = arith.mulf %247, %257 : vector<8x32xf32>
    %259 = arith.addf %256, %258 : vector<8x32xf32>
    %260 = math.tanh %259 : vector<8x32xf32>
    %cst_53 = arith.constant 1.000000e+00 : f32
    %261 = vector.broadcast %cst_53 : f32 to vector<8x32xf32>
    %262 = arith.subf %261, %255 : vector<8x32xf32>
    %263 = arith.mulf %262, %260 : vector<8x32xf32>
    %264 = arith.mulf %255, %203 : vector<8x32xf32>
    %265 = arith.addf %263, %264 : vector<8x32xf32>
    %266 = vector.extract_strided_slice %5 {offsets = [32, 0], sizes = [8, 96], strides = [1, 1]} : vector<64x96xf32> to vector<8x96xf32>
    %267 = arith.truncf %234 : vector<8x32xf32> to vector<8x32xbf16>
    %cst_54 = arith.constant dense<0.000000e+00> : vector<8x96xf32>
    %268 = tpu.matmul %267, %12, %cst_54 {dimension_numbers = #tpu.dot_dimension_numbers<[1], [0], [0], [1], [0, 0, 1, 1], [], []>} : vector<8x32xbf16>, vector<32x96xbf16>, vector<8x96xf32> -> vector<8x96xf32>
    %269 = vector.broadcast %14 : vector<1x96xf32> to vector<8x96xf32>
    %270 = arith.addf %268, %269 : vector<8x96xf32>
    %271 = vector.extract_strided_slice %266 {offsets = [0, 0], sizes = [8, 32], strides = [1, 1]} : vector<8x96xf32> to vector<8x32xf32>
    %272 = vector.extract_strided_slice %270 {offsets = [0, 0], sizes = [8, 32], strides = [1, 1]} : vector<8x96xf32> to vector<8x32xf32>
    %273 = arith.addf %271, %272 : vector<8x32xf32>
    %274 = arith.negf %273 : vector<8x32xf32>
    %275 = math.exp %274 : vector<8x32xf32>
    %cst_55 = arith.constant 1.000000e+00 : f32
    %276 = vector.broadcast %cst_55 : f32 to vector<8x32xf32>
    %277 = arith.addf %276, %275 : vector<8x32xf32>
    %278 = arith.divf %276, %277 : vector<8x32xf32>
    %279 = vector.extract_strided_slice %266 {offsets = [0, 32], sizes = [8, 32], strides = [1, 1]} : vector<8x96xf32> to vector<8x32xf32>
    %280 = vector.extract_strided_slice %270 {offsets = [0, 32], sizes = [8, 32], strides = [1, 1]} : vector<8x96xf32> to vector<8x32xf32>
    %281 = arith.addf %279, %280 : vector<8x32xf32>
    %282 = arith.negf %281 : vector<8x32xf32>
    %283 = math.exp %282 : vector<8x32xf32>
    %cst_56 = arith.constant 1.000000e+00 : f32
    %284 = vector.broadcast %cst_56 : f32 to vector<8x32xf32>
    %285 = arith.addf %284, %283 : vector<8x32xf32>
    %286 = arith.divf %284, %285 : vector<8x32xf32>
    %287 = vector.extract_strided_slice %266 {offsets = [0, 64], sizes = [8, 32], strides = [1, 1]} : vector<8x96xf32> to vector<8x32xf32>
    %288 = vector.extract_strided_slice %270 {offsets = [0, 64], sizes = [8, 32], strides = [1, 1]} : vector<8x96xf32> to vector<8x32xf32>
    %289 = arith.mulf %278, %288 : vector<8x32xf32>
    %290 = arith.addf %287, %289 : vector<8x32xf32>
    %291 = math.tanh %290 : vector<8x32xf32>
    %cst_57 = arith.constant 1.000000e+00 : f32
    %292 = vector.broadcast %cst_57 : f32 to vector<8x32xf32>
    %293 = arith.subf %292, %286 : vector<8x32xf32>
    %294 = arith.mulf %293, %291 : vector<8x32xf32>
    %295 = arith.mulf %286, %234 : vector<8x32xf32>
    %296 = arith.addf %294, %295 : vector<8x32xf32>
    %297 = vector.extract_strided_slice %11 {offsets = [32, 0], sizes = [8, 96], strides = [1, 1]} : vector<64x96xf32> to vector<8x96xf32>
    %298 = arith.truncf %265 : vector<8x32xf32> to vector<8x32xbf16>
    %cst_58 = arith.constant dense<0.000000e+00> : vector<8x96xf32>
    %299 = tpu.matmul %298, %13, %cst_58 {dimension_numbers = #tpu.dot_dimension_numbers<[1], [0], [0], [1], [0, 0, 1, 1], [], []>} : vector<8x32xbf16>, vector<32x96xbf16>, vector<8x96xf32> -> vector<8x96xf32>
    %300 = vector.broadcast %15 : vector<1x96xf32> to vector<8x96xf32>
    %301 = arith.addf %299, %300 : vector<8x96xf32>
    %302 = vector.extract_strided_slice %297 {offsets = [0, 0], sizes = [8, 32], strides = [1, 1]} : vector<8x96xf32> to vector<8x32xf32>
    %303 = vector.extract_strided_slice %301 {offsets = [0, 0], sizes = [8, 32], strides = [1, 1]} : vector<8x96xf32> to vector<8x32xf32>
    %304 = arith.addf %302, %303 : vector<8x32xf32>
    %305 = arith.negf %304 : vector<8x32xf32>
    %306 = math.exp %305 : vector<8x32xf32>
    %cst_59 = arith.constant 1.000000e+00 : f32
    %307 = vector.broadcast %cst_59 : f32 to vector<8x32xf32>
    %308 = arith.addf %307, %306 : vector<8x32xf32>
    %309 = arith.divf %307, %308 : vector<8x32xf32>
    %310 = vector.extract_strided_slice %297 {offsets = [0, 32], sizes = [8, 32], strides = [1, 1]} : vector<8x96xf32> to vector<8x32xf32>
    %311 = vector.extract_strided_slice %301 {offsets = [0, 32], sizes = [8, 32], strides = [1, 1]} : vector<8x96xf32> to vector<8x32xf32>
    %312 = arith.addf %310, %311 : vector<8x32xf32>
    %313 = arith.negf %312 : vector<8x32xf32>
    %314 = math.exp %313 : vector<8x32xf32>
    %cst_60 = arith.constant 1.000000e+00 : f32
    %315 = vector.broadcast %cst_60 : f32 to vector<8x32xf32>
    %316 = arith.addf %315, %314 : vector<8x32xf32>
    %317 = arith.divf %315, %316 : vector<8x32xf32>
    %318 = vector.extract_strided_slice %297 {offsets = [0, 64], sizes = [8, 32], strides = [1, 1]} : vector<8x96xf32> to vector<8x32xf32>
    %319 = vector.extract_strided_slice %301 {offsets = [0, 64], sizes = [8, 32], strides = [1, 1]} : vector<8x96xf32> to vector<8x32xf32>
    %320 = arith.mulf %309, %319 : vector<8x32xf32>
    %321 = arith.addf %318, %320 : vector<8x32xf32>
    %322 = math.tanh %321 : vector<8x32xf32>
    %cst_61 = arith.constant 1.000000e+00 : f32
    %323 = vector.broadcast %cst_61 : f32 to vector<8x32xf32>
    %324 = arith.subf %323, %317 : vector<8x32xf32>
    %325 = arith.mulf %324, %322 : vector<8x32xf32>
    %326 = arith.mulf %317, %265 : vector<8x32xf32>
    %327 = arith.addf %325, %326 : vector<8x32xf32>
    %328 = vector.extract_strided_slice %5 {offsets = [40, 0], sizes = [8, 96], strides = [1, 1]} : vector<64x96xf32> to vector<8x96xf32>
    %329 = arith.truncf %296 : vector<8x32xf32> to vector<8x32xbf16>
    %cst_62 = arith.constant dense<0.000000e+00> : vector<8x96xf32>
    %330 = tpu.matmul %329, %12, %cst_62 {dimension_numbers = #tpu.dot_dimension_numbers<[1], [0], [0], [1], [0, 0, 1, 1], [], []>} : vector<8x32xbf16>, vector<32x96xbf16>, vector<8x96xf32> -> vector<8x96xf32>
    %331 = vector.broadcast %14 : vector<1x96xf32> to vector<8x96xf32>
    %332 = arith.addf %330, %331 : vector<8x96xf32>
    %333 = vector.extract_strided_slice %328 {offsets = [0, 0], sizes = [8, 32], strides = [1, 1]} : vector<8x96xf32> to vector<8x32xf32>
    %334 = vector.extract_strided_slice %332 {offsets = [0, 0], sizes = [8, 32], strides = [1, 1]} : vector<8x96xf32> to vector<8x32xf32>
    %335 = arith.addf %333, %334 : vector<8x32xf32>
    %336 = arith.negf %335 : vector<8x32xf32>
    %337 = math.exp %336 : vector<8x32xf32>
    %cst_63 = arith.constant 1.000000e+00 : f32
    %338 = vector.broadcast %cst_63 : f32 to vector<8x32xf32>
    %339 = arith.addf %338, %337 : vector<8x32xf32>
    %340 = arith.divf %338, %339 : vector<8x32xf32>
    %341 = vector.extract_strided_slice %328 {offsets = [0, 32], sizes = [8, 32], strides = [1, 1]} : vector<8x96xf32> to vector<8x32xf32>
    %342 = vector.extract_strided_slice %332 {offsets = [0, 32], sizes = [8, 32], strides = [1, 1]} : vector<8x96xf32> to vector<8x32xf32>
    %343 = arith.addf %341, %342 : vector<8x32xf32>
    %344 = arith.negf %343 : vector<8x32xf32>
    %345 = math.exp %344 : vector<8x32xf32>
    %cst_64 = arith.constant 1.000000e+00 : f32
    %346 = vector.broadcast %cst_64 : f32 to vector<8x32xf32>
    %347 = arith.addf %346, %345 : vector<8x32xf32>
    %348 = arith.divf %346, %347 : vector<8x32xf32>
    %349 = vector.extract_strided_slice %328 {offsets = [0, 64], sizes = [8, 32], strides = [1, 1]} : vector<8x96xf32> to vector<8x32xf32>
    %350 = vector.extract_strided_slice %332 {offsets = [0, 64], sizes = [8, 32], strides = [1, 1]} : vector<8x96xf32> to vector<8x32xf32>
    %351 = arith.mulf %340, %350 : vector<8x32xf32>
    %352 = arith.addf %349, %351 : vector<8x32xf32>
    %353 = math.tanh %352 : vector<8x32xf32>
    %cst_65 = arith.constant 1.000000e+00 : f32
    %354 = vector.broadcast %cst_65 : f32 to vector<8x32xf32>
    %355 = arith.subf %354, %348 : vector<8x32xf32>
    %356 = arith.mulf %355, %353 : vector<8x32xf32>
    %357 = arith.mulf %348, %296 : vector<8x32xf32>
    %358 = arith.addf %356, %357 : vector<8x32xf32>
    %359 = vector.extract_strided_slice %11 {offsets = [40, 0], sizes = [8, 96], strides = [1, 1]} : vector<64x96xf32> to vector<8x96xf32>
    %360 = arith.truncf %327 : vector<8x32xf32> to vector<8x32xbf16>
    %cst_66 = arith.constant dense<0.000000e+00> : vector<8x96xf32>
    %361 = tpu.matmul %360, %13, %cst_66 {dimension_numbers = #tpu.dot_dimension_numbers<[1], [0], [0], [1], [0, 0, 1, 1], [], []>} : vector<8x32xbf16>, vector<32x96xbf16>, vector<8x96xf32> -> vector<8x96xf32>
    %362 = vector.broadcast %15 : vector<1x96xf32> to vector<8x96xf32>
    %363 = arith.addf %361, %362 : vector<8x96xf32>
    %364 = vector.extract_strided_slice %359 {offsets = [0, 0], sizes = [8, 32], strides = [1, 1]} : vector<8x96xf32> to vector<8x32xf32>
    %365 = vector.extract_strided_slice %363 {offsets = [0, 0], sizes = [8, 32], strides = [1, 1]} : vector<8x96xf32> to vector<8x32xf32>
    %366 = arith.addf %364, %365 : vector<8x32xf32>
    %367 = arith.negf %366 : vector<8x32xf32>
    %368 = math.exp %367 : vector<8x32xf32>
    %cst_67 = arith.constant 1.000000e+00 : f32
    %369 = vector.broadcast %cst_67 : f32 to vector<8x32xf32>
    %370 = arith.addf %369, %368 : vector<8x32xf32>
    %371 = arith.divf %369, %370 : vector<8x32xf32>
    %372 = vector.extract_strided_slice %359 {offsets = [0, 32], sizes = [8, 32], strides = [1, 1]} : vector<8x96xf32> to vector<8x32xf32>
    %373 = vector.extract_strided_slice %363 {offsets = [0, 32], sizes = [8, 32], strides = [1, 1]} : vector<8x96xf32> to vector<8x32xf32>
    %374 = arith.addf %372, %373 : vector<8x32xf32>
    %375 = arith.negf %374 : vector<8x32xf32>
    %376 = math.exp %375 : vector<8x32xf32>
    %cst_68 = arith.constant 1.000000e+00 : f32
    %377 = vector.broadcast %cst_68 : f32 to vector<8x32xf32>
    %378 = arith.addf %377, %376 : vector<8x32xf32>
    %379 = arith.divf %377, %378 : vector<8x32xf32>
    %380 = vector.extract_strided_slice %359 {offsets = [0, 64], sizes = [8, 32], strides = [1, 1]} : vector<8x96xf32> to vector<8x32xf32>
    %381 = vector.extract_strided_slice %363 {offsets = [0, 64], sizes = [8, 32], strides = [1, 1]} : vector<8x96xf32> to vector<8x32xf32>
    %382 = arith.mulf %371, %381 : vector<8x32xf32>
    %383 = arith.addf %380, %382 : vector<8x32xf32>
    %384 = math.tanh %383 : vector<8x32xf32>
    %cst_69 = arith.constant 1.000000e+00 : f32
    %385 = vector.broadcast %cst_69 : f32 to vector<8x32xf32>
    %386 = arith.subf %385, %379 : vector<8x32xf32>
    %387 = arith.mulf %386, %384 : vector<8x32xf32>
    %388 = arith.mulf %379, %327 : vector<8x32xf32>
    %389 = arith.addf %387, %388 : vector<8x32xf32>
    %390 = vector.extract_strided_slice %5 {offsets = [48, 0], sizes = [8, 96], strides = [1, 1]} : vector<64x96xf32> to vector<8x96xf32>
    %391 = arith.truncf %358 : vector<8x32xf32> to vector<8x32xbf16>
    %cst_70 = arith.constant dense<0.000000e+00> : vector<8x96xf32>
    %392 = tpu.matmul %391, %12, %cst_70 {dimension_numbers = #tpu.dot_dimension_numbers<[1], [0], [0], [1], [0, 0, 1, 1], [], []>} : vector<8x32xbf16>, vector<32x96xbf16>, vector<8x96xf32> -> vector<8x96xf32>
    %393 = vector.broadcast %14 : vector<1x96xf32> to vector<8x96xf32>
    %394 = arith.addf %392, %393 : vector<8x96xf32>
    %395 = vector.extract_strided_slice %390 {offsets = [0, 0], sizes = [8, 32], strides = [1, 1]} : vector<8x96xf32> to vector<8x32xf32>
    %396 = vector.extract_strided_slice %394 {offsets = [0, 0], sizes = [8, 32], strides = [1, 1]} : vector<8x96xf32> to vector<8x32xf32>
    %397 = arith.addf %395, %396 : vector<8x32xf32>
    %398 = arith.negf %397 : vector<8x32xf32>
    %399 = math.exp %398 : vector<8x32xf32>
    %cst_71 = arith.constant 1.000000e+00 : f32
    %400 = vector.broadcast %cst_71 : f32 to vector<8x32xf32>
    %401 = arith.addf %400, %399 : vector<8x32xf32>
    %402 = arith.divf %400, %401 : vector<8x32xf32>
    %403 = vector.extract_strided_slice %390 {offsets = [0, 32], sizes = [8, 32], strides = [1, 1]} : vector<8x96xf32> to vector<8x32xf32>
    %404 = vector.extract_strided_slice %394 {offsets = [0, 32], sizes = [8, 32], strides = [1, 1]} : vector<8x96xf32> to vector<8x32xf32>
    %405 = arith.addf %403, %404 : vector<8x32xf32>
    %406 = arith.negf %405 : vector<8x32xf32>
    %407 = math.exp %406 : vector<8x32xf32>
    %cst_72 = arith.constant 1.000000e+00 : f32
    %408 = vector.broadcast %cst_72 : f32 to vector<8x32xf32>
    %409 = arith.addf %408, %407 : vector<8x32xf32>
    %410 = arith.divf %408, %409 : vector<8x32xf32>
    %411 = vector.extract_strided_slice %390 {offsets = [0, 64], sizes = [8, 32], strides = [1, 1]} : vector<8x96xf32> to vector<8x32xf32>
    %412 = vector.extract_strided_slice %394 {offsets = [0, 64], sizes = [8, 32], strides = [1, 1]} : vector<8x96xf32> to vector<8x32xf32>
    %413 = arith.mulf %402, %412 : vector<8x32xf32>
    %414 = arith.addf %411, %413 : vector<8x32xf32>
    %415 = math.tanh %414 : vector<8x32xf32>
    %cst_73 = arith.constant 1.000000e+00 : f32
    %416 = vector.broadcast %cst_73 : f32 to vector<8x32xf32>
    %417 = arith.subf %416, %410 : vector<8x32xf32>
    %418 = arith.mulf %417, %415 : vector<8x32xf32>
    %419 = arith.mulf %410, %358 : vector<8x32xf32>
    %420 = arith.addf %418, %419 : vector<8x32xf32>
    %421 = vector.extract_strided_slice %11 {offsets = [48, 0], sizes = [8, 96], strides = [1, 1]} : vector<64x96xf32> to vector<8x96xf32>
    %422 = arith.truncf %389 : vector<8x32xf32> to vector<8x32xbf16>
    %cst_74 = arith.constant dense<0.000000e+00> : vector<8x96xf32>
    %423 = tpu.matmul %422, %13, %cst_74 {dimension_numbers = #tpu.dot_dimension_numbers<[1], [0], [0], [1], [0, 0, 1, 1], [], []>} : vector<8x32xbf16>, vector<32x96xbf16>, vector<8x96xf32> -> vector<8x96xf32>
    %424 = vector.broadcast %15 : vector<1x96xf32> to vector<8x96xf32>
    %425 = arith.addf %423, %424 : vector<8x96xf32>
    %426 = vector.extract_strided_slice %421 {offsets = [0, 0], sizes = [8, 32], strides = [1, 1]} : vector<8x96xf32> to vector<8x32xf32>
    %427 = vector.extract_strided_slice %425 {offsets = [0, 0], sizes = [8, 32], strides = [1, 1]} : vector<8x96xf32> to vector<8x32xf32>
    %428 = arith.addf %426, %427 : vector<8x32xf32>
    %429 = arith.negf %428 : vector<8x32xf32>
    %430 = math.exp %429 : vector<8x32xf32>
    %cst_75 = arith.constant 1.000000e+00 : f32
    %431 = vector.broadcast %cst_75 : f32 to vector<8x32xf32>
    %432 = arith.addf %431, %430 : vector<8x32xf32>
    %433 = arith.divf %431, %432 : vector<8x32xf32>
    %434 = vector.extract_strided_slice %421 {offsets = [0, 32], sizes = [8, 32], strides = [1, 1]} : vector<8x96xf32> to vector<8x32xf32>
    %435 = vector.extract_strided_slice %425 {offsets = [0, 32], sizes = [8, 32], strides = [1, 1]} : vector<8x96xf32> to vector<8x32xf32>
    %436 = arith.addf %434, %435 : vector<8x32xf32>
    %437 = arith.negf %436 : vector<8x32xf32>
    %438 = math.exp %437 : vector<8x32xf32>
    %cst_76 = arith.constant 1.000000e+00 : f32
    %439 = vector.broadcast %cst_76 : f32 to vector<8x32xf32>
    %440 = arith.addf %439, %438 : vector<8x32xf32>
    %441 = arith.divf %439, %440 : vector<8x32xf32>
    %442 = vector.extract_strided_slice %421 {offsets = [0, 64], sizes = [8, 32], strides = [1, 1]} : vector<8x96xf32> to vector<8x32xf32>
    %443 = vector.extract_strided_slice %425 {offsets = [0, 64], sizes = [8, 32], strides = [1, 1]} : vector<8x96xf32> to vector<8x32xf32>
    %444 = arith.mulf %433, %443 : vector<8x32xf32>
    %445 = arith.addf %442, %444 : vector<8x32xf32>
    %446 = math.tanh %445 : vector<8x32xf32>
    %cst_77 = arith.constant 1.000000e+00 : f32
    %447 = vector.broadcast %cst_77 : f32 to vector<8x32xf32>
    %448 = arith.subf %447, %441 : vector<8x32xf32>
    %449 = arith.mulf %448, %446 : vector<8x32xf32>
    %450 = arith.mulf %441, %389 : vector<8x32xf32>
    %451 = arith.addf %449, %450 : vector<8x32xf32>
    %452 = vector.extract_strided_slice %5 {offsets = [56, 0], sizes = [8, 96], strides = [1, 1]} : vector<64x96xf32> to vector<8x96xf32>
    %453 = arith.truncf %420 : vector<8x32xf32> to vector<8x32xbf16>
    %cst_78 = arith.constant dense<0.000000e+00> : vector<8x96xf32>
    %454 = tpu.matmul %453, %12, %cst_78 {dimension_numbers = #tpu.dot_dimension_numbers<[1], [0], [0], [1], [0, 0, 1, 1], [], []>} : vector<8x32xbf16>, vector<32x96xbf16>, vector<8x96xf32> -> vector<8x96xf32>
    %455 = vector.broadcast %14 : vector<1x96xf32> to vector<8x96xf32>
    %456 = arith.addf %454, %455 : vector<8x96xf32>
    %457 = vector.extract_strided_slice %452 {offsets = [0, 0], sizes = [8, 32], strides = [1, 1]} : vector<8x96xf32> to vector<8x32xf32>
    %458 = vector.extract_strided_slice %456 {offsets = [0, 0], sizes = [8, 32], strides = [1, 1]} : vector<8x96xf32> to vector<8x32xf32>
    %459 = arith.addf %457, %458 : vector<8x32xf32>
    %460 = arith.negf %459 : vector<8x32xf32>
    %461 = math.exp %460 : vector<8x32xf32>
    %cst_79 = arith.constant 1.000000e+00 : f32
    %462 = vector.broadcast %cst_79 : f32 to vector<8x32xf32>
    %463 = arith.addf %462, %461 : vector<8x32xf32>
    %464 = arith.divf %462, %463 : vector<8x32xf32>
    %465 = vector.extract_strided_slice %452 {offsets = [0, 32], sizes = [8, 32], strides = [1, 1]} : vector<8x96xf32> to vector<8x32xf32>
    %466 = vector.extract_strided_slice %456 {offsets = [0, 32], sizes = [8, 32], strides = [1, 1]} : vector<8x96xf32> to vector<8x32xf32>
    %467 = arith.addf %465, %466 : vector<8x32xf32>
    %468 = arith.negf %467 : vector<8x32xf32>
    %469 = math.exp %468 : vector<8x32xf32>
    %cst_80 = arith.constant 1.000000e+00 : f32
    %470 = vector.broadcast %cst_80 : f32 to vector<8x32xf32>
    %471 = arith.addf %470, %469 : vector<8x32xf32>
    %472 = arith.divf %470, %471 : vector<8x32xf32>
    %473 = vector.extract_strided_slice %452 {offsets = [0, 64], sizes = [8, 32], strides = [1, 1]} : vector<8x96xf32> to vector<8x32xf32>
    %474 = vector.extract_strided_slice %456 {offsets = [0, 64], sizes = [8, 32], strides = [1, 1]} : vector<8x96xf32> to vector<8x32xf32>
    %475 = arith.mulf %464, %474 : vector<8x32xf32>
    %476 = arith.addf %473, %475 : vector<8x32xf32>
    %477 = math.tanh %476 : vector<8x32xf32>
    %cst_81 = arith.constant 1.000000e+00 : f32
    %478 = vector.broadcast %cst_81 : f32 to vector<8x32xf32>
    %479 = arith.subf %478, %472 : vector<8x32xf32>
    %480 = arith.mulf %479, %477 : vector<8x32xf32>
    %481 = arith.mulf %472, %420 : vector<8x32xf32>
    %482 = arith.addf %480, %481 : vector<8x32xf32>
    %483 = vector.extract_strided_slice %11 {offsets = [56, 0], sizes = [8, 96], strides = [1, 1]} : vector<64x96xf32> to vector<8x96xf32>
    %484 = arith.truncf %451 : vector<8x32xf32> to vector<8x32xbf16>
    %cst_82 = arith.constant dense<0.000000e+00> : vector<8x96xf32>
    %485 = tpu.matmul %484, %13, %cst_82 {dimension_numbers = #tpu.dot_dimension_numbers<[1], [0], [0], [1], [0, 0, 1, 1], [], []>} : vector<8x32xbf16>, vector<32x96xbf16>, vector<8x96xf32> -> vector<8x96xf32>
    %486 = vector.broadcast %15 : vector<1x96xf32> to vector<8x96xf32>
    %487 = arith.addf %485, %486 : vector<8x96xf32>
    %488 = vector.extract_strided_slice %483 {offsets = [0, 0], sizes = [8, 32], strides = [1, 1]} : vector<8x96xf32> to vector<8x32xf32>
    %489 = vector.extract_strided_slice %487 {offsets = [0, 0], sizes = [8, 32], strides = [1, 1]} : vector<8x96xf32> to vector<8x32xf32>
    %490 = arith.addf %488, %489 : vector<8x32xf32>
    %491 = arith.negf %490 : vector<8x32xf32>
    %492 = math.exp %491 : vector<8x32xf32>
    %cst_83 = arith.constant 1.000000e+00 : f32
    %493 = vector.broadcast %cst_83 : f32 to vector<8x32xf32>
    %494 = arith.addf %493, %492 : vector<8x32xf32>
    %495 = arith.divf %493, %494 : vector<8x32xf32>
    %496 = vector.extract_strided_slice %483 {offsets = [0, 32], sizes = [8, 32], strides = [1, 1]} : vector<8x96xf32> to vector<8x32xf32>
    %497 = vector.extract_strided_slice %487 {offsets = [0, 32], sizes = [8, 32], strides = [1, 1]} : vector<8x96xf32> to vector<8x32xf32>
    %498 = arith.addf %496, %497 : vector<8x32xf32>
    %499 = arith.negf %498 : vector<8x32xf32>
    %500 = math.exp %499 : vector<8x32xf32>
    %cst_84 = arith.constant 1.000000e+00 : f32
    %501 = vector.broadcast %cst_84 : f32 to vector<8x32xf32>
    %502 = arith.addf %501, %500 : vector<8x32xf32>
    %503 = arith.divf %501, %502 : vector<8x32xf32>
    %504 = vector.extract_strided_slice %483 {offsets = [0, 64], sizes = [8, 32], strides = [1, 1]} : vector<8x96xf32> to vector<8x32xf32>
    %505 = vector.extract_strided_slice %487 {offsets = [0, 64], sizes = [8, 32], strides = [1, 1]} : vector<8x96xf32> to vector<8x32xf32>
    %506 = arith.mulf %495, %505 : vector<8x32xf32>
    %507 = arith.addf %504, %506 : vector<8x32xf32>
    %508 = math.tanh %507 : vector<8x32xf32>
    %cst_85 = arith.constant 1.000000e+00 : f32
    %509 = vector.broadcast %cst_85 : f32 to vector<8x32xf32>
    %510 = arith.subf %509, %503 : vector<8x32xf32>
    %511 = arith.mulf %510, %508 : vector<8x32xf32>
    %512 = arith.mulf %503, %451 : vector<8x32xf32>
    %513 = arith.addf %511, %512 : vector<8x32xf32>
    %514 = tpu.concatenate %48, %110, %172, %234, %296, %358, %420, %482 in 0 : vector<8x32xf32>, vector<8x32xf32>, vector<8x32xf32>, vector<8x32xf32>, vector<8x32xf32>, vector<8x32xf32>, vector<8x32xf32>, vector<8x32xf32> -> vector<64x32xf32>
    %515 = tpu.concatenate %513, %451, %389, %327, %265, %203, %141, %79 in 0 : vector<8x32xf32>, vector<8x32xf32>, vector<8x32xf32>, vector<8x32xf32>, vector<8x32xf32>, vector<8x32xf32>, vector<8x32xf32>, vector<8x32xf32> -> vector<64x32xf32>
    %516 = tpu.concatenate %514, %515 in 1 : vector<64x32xf32>, vector<64x32xf32> -> vector<64x64xf32>
    %517 = arith.truncf %516 : vector<64x64xf32> to vector<64x64xbf16>
    %c0_86 = arith.constant 0 : index
    %c0_87 = arith.constant 0 : index
    %518 = vector.load %arg2[%c0_86, %c0_87] : memref<64x8xf32, #tpu.memory_space<vmem>>, vector<64x8xf32>
    %c0_88 = arith.constant 0 : index
    %c0_89 = arith.constant 0 : index
    %519 = vector.load %arg3[%c0_88, %c0_89] : memref<64x8xf32, #tpu.memory_space<vmem>>, vector<64x8xf32>
    %c0_90 = arith.constant 0 : index
    %c0_91 = arith.constant 0 : index
    %520 = vector.load %arg13[%c0_90, %c0_91] : memref<64x8xbf16, #tpu.memory_space<vmem>>, vector<64x8xbf16>
    %cst_92 = arith.constant dense<0.000000e+00> : vector<64x8xf32>
    %521 = tpu.matmul %517, %520, %cst_92 {dimension_numbers = #tpu.dot_dimension_numbers<[1], [0], [0], [1], [0, 0, 1, 1], [], []>} : vector<64x64xbf16>, vector<64x8xbf16>, vector<64x8xf32> -> vector<64x8xf32>
    %c0_93 = arith.constant 0 : index
    %c0_94 = arith.constant 0 : index
    %522 = vector.load %arg14[%c0_93, %c0_94] : memref<1x8xf32, #tpu.memory_space<vmem>>, vector<1x8xf32>
    %523 = vector.broadcast %522 : vector<1x8xf32> to vector<64x8xf32>
    %524 = arith.addf %521, %523 : vector<64x8xf32>
    %525 = arith.mulf %519, %518 : vector<64x8xf32>
    %cst_95 = arith.constant 1.000000e+00 : f32
    %526 = vector.broadcast %cst_95 : f32 to vector<64x8xf32>
    %527 = arith.subf %526, %519 : vector<64x8xf32>
    %528 = arith.mulf %527, %524 : vector<64x8xf32>
    %529 = arith.addf %525, %528 : vector<64x8xf32>
    %530 = tpu.concatenate %518, %529, %519 in 1 : vector<64x8xf32>, vector<64x8xf32>, vector<64x8xf32> -> vector<64x24xf32>
    %531 = arith.truncf %530 : vector<64x24xf32> to vector<64x24xbf16>
    %c0_96 = arith.constant 0 : index
    %c0_97 = arith.constant 0 : index
    %532 = vector.load %arg15[%c0_96, %c0_97] : memref<24x8xbf16, #tpu.memory_space<vmem>>, vector<24x8xbf16>
    %cst_98 = arith.constant dense<0.000000e+00> : vector<64x8xf32>
    %533 = tpu.matmul %531, %532, %cst_98 {dimension_numbers = #tpu.dot_dimension_numbers<[1], [0], [0], [1], [0, 0, 1, 1], [], []>} : vector<64x24xbf16>, vector<24x8xbf16>, vector<64x8xf32> -> vector<64x8xf32>
    %c0_99 = arith.constant 0 : index
    %c0_100 = arith.constant 0 : index
    %534 = vector.load %arg16[%c0_99, %c0_100] : memref<1x8xf32, #tpu.memory_space<vmem>>, vector<1x8xf32>
    %535 = vector.broadcast %534 : vector<1x8xf32> to vector<64x8xf32>
    %536 = arith.addf %533, %535 : vector<64x8xf32>
    %537 = math.tanh %536 : vector<64x8xf32>
    %538 = arith.truncf %537 : vector<64x8xf32> to vector<64x8xbf16>
    %c0_101 = arith.constant 0 : index
    %c0_102 = arith.constant 0 : index
    %539 = vector.load %arg17[%c0_101, %c0_102] : memref<8x8xbf16, #tpu.memory_space<vmem>>, vector<8x8xbf16>
    %cst_103 = arith.constant dense<0.000000e+00> : vector<64x8xf32>
    %540 = tpu.matmul %538, %539, %cst_103 {dimension_numbers = #tpu.dot_dimension_numbers<[1], [0], [0], [1], [0, 0, 1, 1], [], []>} : vector<64x8xbf16>, vector<8x8xbf16>, vector<64x8xf32> -> vector<64x8xf32>
    %c0_104 = arith.constant 0 : index
    %c0_105 = arith.constant 0 : index
    %541 = vector.load %arg18[%c0_104, %c0_105] : memref<1x8xf32, #tpu.memory_space<vmem>>, vector<1x8xf32>
    %542 = vector.broadcast %541 : vector<1x8xf32> to vector<64x8xf32>
    %543 = arith.addf %540, %542 : vector<64x8xf32>
    %c0_106 = arith.constant 0 : index
    %c0_107 = arith.constant 0 : index
    %544 = vector.load %arg4[%c0_106, %c0_107] : memref<8x64xf32, #tpu.memory_space<vmem>>, vector<8x64xf32>
    %545 = arith.subf %543, %518 : vector<64x8xf32>
    %546 = arith.mulf %545, %545 : vector<64x8xf32>
    %547 = arith.mulf %546, %519 : vector<64x8xf32>
    %548 = arith.subf %524, %518 : vector<64x8xf32>
    %549 = arith.mulf %548, %548 : vector<64x8xf32>
    %550 = arith.mulf %549, %519 : vector<64x8xf32>
    %cst_108 = arith.constant dense<0.000000e+00> : vector<8x8xf32>
    %551 = tpu.matmul %544, %547, %cst_108 {dimension_numbers = #tpu.dot_dimension_numbers<[1], [0], [0], [1], [0, 0, 1, 1], [], []>} : vector<8x64xf32>, vector<64x8xf32>, vector<8x8xf32> -> vector<8x8xf32>
    %cst_109 = arith.constant dense<0.000000e+00> : vector<8xf32>
    %552 = vector.multi_reduction <add>, %551, %cst_109 [1] : vector<8x8xf32> to vector<8xf32>
    %553 = vector.shape_cast %552 : vector<8xf32> to vector<8x1xf32>
    %cst_110 = arith.constant dense<0.000000e+00> : vector<8x8xf32>
    %554 = tpu.matmul %544, %550, %cst_110 {dimension_numbers = #tpu.dot_dimension_numbers<[1], [0], [0], [1], [0, 0, 1, 1], [], []>} : vector<8x64xf32>, vector<64x8xf32>, vector<8x8xf32> -> vector<8x8xf32>
    %cst_111 = arith.constant dense<0.000000e+00> : vector<8xf32>
    %555 = vector.multi_reduction <add>, %554, %cst_111 [1] : vector<8x8xf32> to vector<8xf32>
    %556 = vector.shape_cast %555 : vector<8xf32> to vector<8x1xf32>
    %cst_112 = arith.constant dense<0.000000e+00> : vector<8x8xf32>
    %557 = tpu.matmul %544, %519, %cst_112 {dimension_numbers = #tpu.dot_dimension_numbers<[1], [0], [0], [1], [0, 0, 1, 1], [], []>} : vector<8x64xf32>, vector<64x8xf32>, vector<8x8xf32> -> vector<8x8xf32>
    %cst_113 = arith.constant dense<0.000000e+00> : vector<8xf32>
    %558 = vector.multi_reduction <add>, %557, %cst_113 [1] : vector<8x8xf32> to vector<8xf32>
    %559 = vector.shape_cast %558 : vector<8xf32> to vector<8x1xf32>
    %cst_114 = arith.constant 9.99999996E-13 : f32
    %560 = vector.broadcast %cst_114 : f32 to vector<8x1xf32>
    %561 = arith.addf %559, %560 : vector<8x1xf32>
    %562 = arith.divf %553, %561 : vector<8x1xf32>
    %563 = math.sqrt %562 : vector<8x1xf32>
    %564 = arith.divf %556, %561 : vector<8x1xf32>
    %565 = math.sqrt %564 : vector<8x1xf32>
    %566 = arith.addf %563, %565 : vector<8x1xf32>
    %cst_115 = arith.constant dense<0.000000e+00> : vector<1xf32>
    %567 = vector.multi_reduction <add>, %566, %cst_115 [0] : vector<8x1xf32> to vector<1xf32>
    %568 = vector.shape_cast %567 : vector<1xf32> to vector<1x1xf32>
    %cst_116 = arith.constant 8.000000e+00 : f32
    %569 = vector.broadcast %cst_116 : f32 to vector<1x1xf32>
    %570 = arith.divf %568, %569 : vector<1x1xf32>
    %c0_117 = arith.constant 0 : index
    %c0_118 = arith.constant 0 : index
    %571 = vector.load %arg20[%c0_117, %c0_118] : memref<1x1xf32, #tpu.memory_space<vmem>>, vector<1x1xf32>
    tpu.vector_store %arg20[%c0_117, %c0_118], %570 {strides = array<i32>} : memref<1x1xf32, #tpu.memory_space<vmem>>, vector<1x1xf32>,
    %572 = arith.mulf %519, %518 : vector<64x8xf32>
    %cst_119 = arith.constant 1.000000e+00 : f32
    %573 = vector.broadcast %cst_119 : f32 to vector<64x8xf32>
    %574 = arith.subf %573, %519 : vector<64x8xf32>
    %575 = arith.mulf %574, %543 : vector<64x8xf32>
    %576 = arith.addf %572, %575 : vector<64x8xf32>
    %c0_120 = arith.constant 0 : index
    %c0_121 = arith.constant 0 : index
    %577 = vector.load %arg19[%c0_120, %c0_121] : memref<64x8xf32, #tpu.memory_space<vmem>>, vector<64x8xf32>
    tpu.vector_store %arg19[%c0_120, %c0_121], %576 {strides = array<i32>} : memref<64x8xf32, #tpu.memory_space<vmem>>, vector<64x8xf32>,
    return
  }
}

</mosaic_0001>

<bundles_post_ra>
// kernel: tpu_custom_call.1
= control target key start
LH: loop header
LB: loop body
LE: loop exit
PB: predicated region body
PF: predicated region fallthrough
CT: control target
= control target key end

     0   :  { %s3996_s0 = inlined_call_operand.vmem [shape: bf16[64,24], index: 0, kind: input, shape index: {}]   ;;  %s3997_s1 = inlined_call_operand.vmem [shape: bf16[64,24], index: 1, kind: input, shape index: {}]   ;;  %s3998_s2 = inlined_call_operand.vmem [shape: f32[64,8], index: 2, kind: input, shape index: {}]   ;;  %s3999_s3 = inlined_call_operand.vmem [shape: f32[64,8], index: 3, kind: input, shape index: {}]   ;;  %s4000_s4 = inlined_call_operand.vmem [shape: f32[8,64], index: 4, kind: input, shape index: {}]   ;;  %s4001_s5 = inlined_call_operand.vmem [shape: bf16[24,96], index: 5, kind: input, shape index: {}]   ;;  %s4002_s6 = inlined_call_operand.vmem [shape: bf16[32,96], index: 6, kind: input, shape index: {}]   ;;  %s4003_s7 = inlined_call_operand.vmem [shape: f32[1,96], index: 7, kind: input, shape index: {}]   ;;  %s4004_s8 = inlined_call_operand.vmem [shape: f32[1,96], index: 8, kind: input, shape index: {}]   ;;  %s4005_s9 = inlined_call_operand.vmem [shape: bf16[24,96], index: 9, kind: input, shape index: {}]   ;;  %s4006_s10 = inlined_call_operand.vmem [shape: bf16[32,96], index: 10, kind: input, shape index: {}]   ;;  %s4007_s11 = inlined_call_operand.vmem [shape: f32[1,96], index: 11, kind: input, shape index: {}]   ;;  %s4008_s12 = inlined_call_operand.vmem [shape: f32[1,96], index: 12, kind: input, shape index: {}]   ;;  %s4009_s13 = inlined_call_operand.vmem [shape: bf16[64,8], index: 13, kind: input, shape index: {}]   ;;  %s4010_s14 = inlined_call_operand.vmem [shape: f32[1,8], index: 14, kind: input, shape index: {}]   ;;  %s4011_s15 = inlined_call_operand.vmem [shape: bf16[24,8], index: 15, kind: input, shape index: {}]   ;;  %s4012_s16 = inlined_call_operand.vmem [shape: f32[1,8], index: 16, kind: input, shape index: {}]   ;;  %s4013_s17 = inlined_call_operand.vmem [shape: bf16[8,8], index: 17, kind: input, shape index: {}]   ;;  %s4014_s18 = inlined_call_operand.vmem [shape: f32[1,8], index: 18, kind: input, shape index: {}]   ;;  %s4015_s19 = inlined_call_operand.vmem [shape: f32[64,8], index: 19, kind: output, shape index: {0}]   ;;  %s4016_s20 = inlined_call_operand.hbm [shape: f32[1,1], index: 20, kind: output, shape index: {1}]  }
   0x1   :  { %4021 = sst [smem:[#allocation5_spill]] %s3996_s0 }
   0x2   :  { %4022 = sst [smem:[#allocation6_spill]] %s3997_s1 }
   0x3   :  { %4023 = sst [smem:[#allocation7_spill]] %s3998_s2 }
   0x4   :  { %4024 = sst [smem:[#allocation8_spill]] %s3999_s3 }
   0x5   :  { %4025 = sst [smem:[#allocation9_spill]] %s4000_s4 }
   0x6   :  { %v2869_v0 = vld [vmem:[%s4001_s5 + $0x8] ss:$0 sps:$4 sm:$0xff]   ;;  %vm126_vm0 = vcmask 1043456   ;;  %v2870_v1 = vld [vmem:[%s4001_s5] sm:$0xff]   ;;  %s4026_s27 = sld [smem:[#allocation5_spill]]  ;;  %vm113_vm1 = vcmask 195584  }
   0x7   :  { %2797 = vmatprep.subr.msk.bf16.mxu0 %vm126_vm0, %v2869_v0  ;;  %v128_v2 = vsel %vm126_vm0, %v2869_v0, 0  ;;  %v2871_v3 = vld [vmem:[%s4005_s9 + $0x8] ss:$0 sps:$4 sm:$0xff]   ;;  %v2874_v7 = vld [vmem:[%s4005_s9] sm:$0xff]   ;;  %s4027_s22 = sld [smem:[#allocation6_spill]]  ;;  %v3032_v10 = vmov 0.0  }
   0x8   :  { %2551 = vmatpush3.bf16.msra.mxu0 %v128_v2  ;;  %2798 = vmatprep.subr.msk.bf16.mxu1 %vm126_vm0, %v2871_v3  ;;  %v255_v5 = vsel %vm126_vm0, %v2871_v3, 0  ;;  %v3171_v8 = vld [vmem:[%s4002_s6 + $0x8] sm:$0xff]   ;;  %v3191_v13 = vld [vmem:[%s4002_s6] sm:$0xff]   ;;  %vm3033_vm2 = vmmov 0  }
   0x9   :  { %2552 = vmatprep.subr.bf16.mxu0 %v2870_v1  ;;  %2563 = vmatpush3.bf16.msra.mxu1 %v255_v5  ;;  %v3208_v17 = vld [vmem:[%s4006_s10 + $0x8] sm:$0xff]   ;;  %v3214_v18 = vld [vmem:[%s4006_s10] sm:$0xff]  }
   0xa   :  { %2564 = vmatprep.subr.bf16.mxu1 %v2874_v7 }
   0xc   :  { %v2872_v4 = vld [vmem:[%s4026_s27] sm:$0xff]   ;;  %v2873_v6 = vld [vmem:[%s4026_s27 + $0x8] sm:$0xff]   ;;  %2553 = vmatpush3.bf16.msra.mxu0 %v2870_v1  ;;  %v2878_v12 = vld [vmem:[%s4026_s27 + $0x10] sm:$0xff]  }
   0xd   :  { %2554 = vmatprep.mubr.msk.bf16.mxu0 %vm113_vm1, %v2872_v4  ;;  %v2876_v9 = vld [vmem:[%s4027_s22] sm:$0xff]   ;;  %2574 = vmatprep.subr.bf16.mxu0 %v3032_v10  ;;  %v2877_v11 = vld [vmem:[%s4027_s22 + $0x8] sm:$0xff]   ;;  %v2881_v14 = vld [vmem:[%s4027_s22 + $0x10] sm:$0xff]  }
   0xe   :  { %2565 = vmatpush3.bf16.msra.mxu1 %v2874_v7  ;;  %2566 = vmatprep.mubr.msk.bf16.mxu1 %vm113_vm1, %v2876_v9  ;;  %v2879_v15 = vld [vmem:[%s4026_s27 + $0x18] sm:$0xff]  }
   0xf   :  { %2555 = vmatmul.mubr.msk.bf16.vlgmr.msra.gmra.mxu0 %vm113_vm1, %v2873_v6  ;;  %2582 = vmatprep.subr.bf16.mxu1 %v3032_v10  ;;  %v2882_v16 = vld [vmem:[%s4027_s22 + $0x18] sm:$0xff]  }
  0x10   :  { %2575 = vmatpush3.bf16.msra.mxu0 %v3171_v8  ;;  %2558 = vmatprep.mubr.msk.bf16.mxu0 %vm113_vm1, %v2878_v12 }
  0x11   :  { %2567 = vmatmul.mubr.msk.bf16.vlgmr.msra.gmra.mxu1 %vm113_vm1, %v2877_v11  ;;  %2576 = vmatprep.subr.bf16.mxu0 %v3032_v10 }
  0x12   :  { %2570 = vmatprep.mubr.msk.bf16.mxu1 %vm113_vm1, %v2881_v14  ;;  %2583 = vmatpush3.bf16.msra.mxu1 %v3208_v17 }
  0x13   :  { %2584 = vmatprep.subr.bf16.mxu1 %v3032_v10 }
  0x14   :  { %2577 = vmatpush3.bf16.msra.mxu0 %v3191_v13 }
  0x15   :  { %2590 = vmatprep.subr.bf16.mxu0 %v3032_v10 }
  0x17   :  { %2559 = vmatmul.mubr.msk.bf16.gmra.mxu0 %vm113_vm1, %v2879_v15 }
  0x18   :  { %2578 = vmatprep.mubr.msk.bf16.mxu0 %vm3033_vm2, %v3032_v10 }
  0x19   :  { %26 = vsyncpa [#allocation3], 0  ;;  %2571 = vmatmul.mubr.msk.bf16.gmra.mxu1 %vm113_vm1, %v2882_v16  ;;  %v3034_v19 = vmov 0   ;;  %v2362_v20 = vld [vmem:[%s4003_s7] ss:$0 sm:$0xff]  ;;  %s3035_s25 = smov 64  }
  0x1a   :  { %2585 = vmatpush3.bf16.msra.mxu1 %v3214_v18  ;;  %2586 = vmatprep.mubr.msk.bf16.mxu1 %vm3033_vm2, %v3032_v10  ;;  %v2373_v25 = vld [vmem:[%s4007_s11] ss:$0 sm:$0xff]  ;;  %vm350_vm3 = vcmask 261120   ;;  %vm1625_vm4 = vcmask 523264   ;;  %s4028_s1 = sld [smem:[#allocation8_spill]]  ;;  %s3038_s0 = smov 16  }
  0x1b   :  { %2598 = vmatprep.subr.bf16.mxu1 %v3032_v10  ;;  %v3270_v48 = vld [vmem:[%s4004_s8] ss:$0 sm:$0xff]  ;;  %s3036_s8 = smov 96   ;;  %s4029_s2 = sld [smem:[#allocation7_spill]]  ;;  %vm1799_vm5 = vcmask 64512   ;;  %vm1808_vm6 = vcmask 130048  }
  0x1c   :  { %v3279_v53 = vld [vmem:[%s4008_s12] ss:$0 sm:$0xff]  ;;  %s4030_s21 = sld [smem:[#allocation9_spill]]  ;;  %vm2318_vm11 = vcmask 0  }
  0x1f   :  { %2579 = vmatmul.mubr.bf16.vlgmr.msra.gmra.mxu0 %v3034_v19 }
  0x20   :  { %2591 = vmatpush3.bf16.msra.mxu0 %v3171_v8  ;;  %2594 = vmatprep.mubr.msk.bf16.mxu0 %vm3033_vm2, %v3032_v10 }
  0x21   :  { %2587 = vmatmul.mubr.bf16.vlgmr.msra.gmra.mxu1 %v3034_v19  ;;  %2592 = vmatprep.subr.bf16.mxu0 %v3032_v10 }
  0x22   :  { %2599 = vmatpush3.bf16.msra.mxu1 %v3208_v17  ;;  %2602 = vmatprep.mubr.msk.bf16.mxu1 %vm3033_vm2, %v3032_v10 }
  0x23   :  { %2600 = vmatprep.subr.bf16.mxu1 %v3032_v10 }
  0x24   :  { %2593 = vmatpush3.bf16.msra.mxu0 %v3191_v13 }
  0x25   :  { %2606 = vmatprep.subr.bf16.mxu0 %v3032_v10 }
  0x26   :  { %2601 = vmatpush3.bf16.msra.mxu1 %v3214_v18 }
  0x27   :  { %2614 = vmatprep.subr.bf16.mxu1 %v3032_v10 }
  0xcf   :  { %v2556_v21 = vpop.f32.mrf.mxu0 }
  0xd0   :  { %v3242_v22 = vadd.f32 %v2556_v21, %v2362_v20 }
  0xd1   :  { %v164_v23 = vpop.f32.mrf.mxu0  ;;  %v2568_v24 = vpop.f32.mrf.mxu1 }
  0xd2   :  { %v3247_v26 = vadd.f32 %v2568_v24, %v2373_v25  ;;  %v165_v0 = vadd.f32 %v2362_v20, %v164_v23 }
  0xd3   :  { %v2557_v27 = vpop.f32.mrf.mxu0  ;;  %v291_v28 = vpop.f32.mrf.mxu1 }
  0xd4   :  { %v3249_v29 = vadd.f32 %v2557_v27, %v2362_v20  ;;  %v292_v1 = vadd.f32 %v2373_v25, %v291_v28 }
  0xd5   :  { %v167_v30 = vpop.f32.mrf.mxu0  ;;  %v2569_v31 = vpop.f32.mrf.mxu1 }
  0xd6   :  { %v3251_v32 = vadd.f32 %v2362_v20, %v167_v30  ;;  %v3253_v33 = vadd.f32 %v2569_v31, %v2373_v25 }
  0xd7   :  { %v2560_v34 = vpop.f32.mrf.mxu0  ;;  %v294_v35 = vpop.f32.mrf.mxu1 }
  0xd8   :  { %v3255_v36 = vadd.f32 %v2560_v34, %v2362_v20  ;;  %v3257_v37 = vadd.f32 %v2373_v25, %v294_v35 }
  0xd9   :  { %v180_v38 = vpop.f32.mrf.mxu0  ;;  %v2572_v39 = vpop.f32.mrf.mxu1 }
  0xda   :  { %v3259_v40 = vadd.f32 %v2362_v20, %v180_v38  ;;  %v3261_v41 = vadd.f32 %v2572_v39, %v2373_v25 }
  0xdb   :  { %v2561_v42 = vpop.f32.mrf.mxu0  ;;  %v307_v43 = vpop.f32.mrf.mxu1 }
  0xdc   :  { %v3263_v44 = vadd.f32 %v2561_v42, %v2362_v20  ;;  %v3265_v45 = vadd.f32 %v2373_v25, %v307_v43 }
  0xdd   :  { %v183_v46 = vpop.f32.mrf.mxu0  ;;  %v2573_v47 = vpop.f32.mrf.mxu1 }
  0xde   :  { %v3272_v49 = vadd.f32 %v2362_v20, %v183_v46  ;;  %v3274_v50 = vadd.f32 %v2573_v47, %v2373_v25 }
  0xdf   :  { %v388_v51 = vpop.f32.mrf.mxu0  ;;  %v310_v52 = vpop.f32.mrf.mxu1 }
  0xe0   :  { %v389_v54 = vadd.f32 %v3270_v48, %v388_v51  ;;  %v3282_v55 = vadd.f32 %v2373_v25, %v310_v52 }
  0xe1   :  { %v2580_v56 = vpop.f32.mrf.mxu0  ;;  %v472_v57 = vpop.f32.mrf.mxu1 }
  0xe2   :  { %402 = vrot.lane.b32.xlu0 %v389_v54, %s3035_s25  ;;  %v473_v58 = vadd.f32 %v3279_v53, %v472_v57  ;;  %v394_v2 = vadd.f32 %v389_v54, %v165_v0 }
  0xe3   :  { %v391_v59 = vpop.f32.mrf.mxu0  ;;  %v2588_v60 = vpop.f32.mrf.mxu1 }
  0xe4   :  { %v478_v3 = vadd.f32 %v473_v58, %v292_v1  ;;  %v2387_v4 = vmul.f32 -1.442695, %v394_v2 }
  0xe5   :  { %v2581_v61 = vpop.f32.mrf.mxu0  ;;  %v475_v62 = vpop.f32.mrf.mxu1 }
  0xe6   :  { %486 = vrot.lane.b32.xlu0 %v473_v58, %s3035_s25  ;;  %v2391_v5 = vmul.f32 -1.442695, %v478_v3  ;;  %2891 = vpow2.f32 %v2387_v4 }
  0xe7   :  { %v2589_v63 = vpop.f32.mrf.mxu1 }
  0xe8   :  { %2893 = vpow2.f32 %v2391_v5 }
  0xf3   :  { %v2892_v6 = vpop.eup %2891 }
  0xf4   :  { %v398_v9 = vadd.f32 1.0, %v2892_v6 }
  0xf5   :  { %v2894_v7 = vpop.eup %2893 }
  0xf6   :  { %v482_v11 = vadd.f32 1.0, %v2894_v7  ;;  %2895 = vrcp.f32 %v398_v9 }
  0xf8   :  { %2897 = vrcp.f32 %v482_v11 }
 0x103   :  { %v2896_v12 = vpop.eup %2895 }
 0x104   :  { %v412_v30 = vsub.f32 1.0, %v2896_v12  ;;  %v418_v34 = vmul.f32 0.0, %v2896_v12 }
 0x105   :  { %v2898_v16 = vpop.eup %2897 }
 0x106   :  { %v496_v39 = vsub.f32 1.0, %v2898_v16  ;;  %v502_v43 = vmul.f32 0.0, %v2898_v16 }
 0x154   :  { %v403_v14 = vpop.permute.xlu0 %402 }
 0x155   :  { %v405_v15 = vmul.f32 %v2896_v12, %v403_v14 }
 0x157   :  { %407 = vrot.lane.b32.xlu1 %v405_v15, %s3035_s25 }
 0x158   :  { %v487_v19 = vpop.permute.xlu0 %486 }
 0x159   :  { %v489_v20 = vmul.f32 %v2898_v16, %v487_v19 }
 0x15b   :  { %491 = vrot.lane.b32.xlu1 %v489_v20, %s3035_s25 }
 0x1c9   :  { %v408_v21 = vpop.permute.xlu1 %407 }
 0x1ca   :  { %v410_v23 = vadd.f32 %v408_v21, %v165_v0 }
 0x1cc   :  { %2899 = vtanh.f32 %v410_v23 }
 0x1cd   :  { %v492_v24 = vpop.permute.xlu1 %491 }
 0x1ce   :  { %v494_v25 = vadd.f32 %v492_v24, %v292_v1 }
 0x1d0   :  { %2901 = vtanh.f32 %v494_v25 }
 0x1d9   :  { %v2900_v27 = vpop.eup %2899 }
 0x1da   :  { %414 = vrot.lane.b32.xlu0 %v2900_v27, %s3036_s8 }
 0x1dd   :  { %v2902_v28 = vpop.eup %2901 }
 0x1de   :  { %498 = vrot.lane.b32.xlu1 %v2902_v28, %s3036_s8 }
 0x24c   :  { %v415_v31 = vpop.permute.xlu0 %414 }
 0x24d   :  { %v417_v35 = vmul.f32 %v415_v31, %v412_v30 }
 0x24f   :  { %v3291_v38 = vadd.f32 %v418_v34, %v417_v35 }
 0x250   :  { %v499_v42 = vpop.permute.xlu1 %498 }
 0x251   :  { %v501_v46 = vmul.f32 %v499_v42, %v496_v39  ;;  %v504_v47 = vpack.c.bf16 %v3291_v38, %v3291_v38 }
 0x253   :  { %v3295_v51 = vadd.f32 %v502_v43, %v501_v46  ;;  %506 = vrot.lane.b32.xlu0 %v504_v47, %s3036_s8 }
 0x255   :  { %v577_v52 = vpack.c.bf16 %v3295_v51, %v3295_v51 }
 0x257   :  { %579 = vrot.lane.b32.xlu1 %v577_v52, %s3036_s8 }
 0x2c5   :  { %v507_v54 = vpop.permute.xlu0 %506 }
 0x2c6   :  { %2595 = vmatmul.mubr.msk.bf16.vlgmr.msra.gmra.mxu0 %vm350_vm3, %v507_v54 }
 0x2c7   :  { %2607 = vmatpush3.bf16.msra.mxu0 %v3171_v8  ;;  %2610 = vmatprep.mubr.msk.bf16.mxu0 %vm3033_vm2, %v3032_v10 }
 0x2c8   :  { %2608 = vmatprep.subr.bf16.mxu0 %v3032_v10 }
 0x2c9   :  { %v580_v56 = vpop.permute.xlu1 %579 }
 0x2ca   :  { %2603 = vmatmul.mubr.msk.bf16.vlgmr.msra.gmra.mxu1 %vm350_vm3, %v580_v56 }
 0x2cb   :  { %2609 = vmatpush3.bf16.msra.mxu0 %v3191_v13  ;;  %2615 = vmatpush3.bf16.msra.mxu1 %v3208_v17 }
 0x2cc   :  { %2616 = vmatprep.subr.bf16.mxu1 %v3032_v10  ;;  %2618 = vmatprep.mubr.msk.bf16.mxu1 %vm3033_vm2, %v3032_v10 }
 0x2cd   :  { %2622 = vmatprep.subr.bf16.mxu0 %v3032_v10 }
 0x2cf   :  { %2617 = vmatpush3.bf16.msra.mxu1 %v3214_v18 }
 0x2d0   :  { %2630 = vmatprep.subr.bf16.mxu1 %v3032_v10 }
 0x386   :  { %v545_v57 = vpop.f32.mrf.mxu0 }
 0x387   :  { %v546_v58 = vadd.f32 %v3270_v48, %v545_v57 }
 0x388   :  { %v2596_v59 = vpop.f32.mrf.mxu0 }
 0x389   :  { %559 = vrot.lane.b32.xlu0 %v546_v58, %s3035_s25  ;;  %v551_v3 = vadd.f32 %v546_v58, %v3251_v32 }
 0x38a   :  { %v548_v60 = vpop.f32.mrf.mxu0  ;;  %v618_v61 = vpop.f32.mrf.mxu1 }
 0x38b   :  { %v619_v62 = vadd.f32 %v3279_v53, %v618_v61  ;;  %v2393_v4 = vmul.f32 -1.442695, %v551_v3 }
 0x38c   :  { %v2597_v63 = vpop.f32.mrf.mxu0  ;;  %v2604_v0 = vpop.f32.mrf.mxu1 }
 0x38d   :  { %632 = vrot.lane.b32.xlu1 %v619_v62, %s3035_s25  ;;  %v624_v5 = vadd.f32 %v619_v62, %v3257_v37  ;;  %2903 = vpow2.f32 %v2393_v4 }
 0x38e   :  { %v621_v1 = vpop.f32.mrf.mxu1 }
 0x38f   :  { %v2395_v6 = vmul.f32 -1.442695, %v624_v5 }
 0x390   :  { %v2605_v2 = vpop.f32.mrf.mxu1 }
 0x391   :  { %2905 = vpow2.f32 %v2395_v6 }
 0x39a   :  { %v2904_v7 = vpop.eup %2903 }
 0x39b   :  { %v555_v9 = vadd.f32 1.0, %v2904_v7 }
 0x39d   :  { %2907 = vrcp.f32 %v555_v9 }
 0x39e   :  { %v2906_v11 = vpop.eup %2905 }
 0x39f   :  { %v628_v12 = vadd.f32 1.0, %v2906_v11 }
 0x3a1   :  { %2909 = vrcp.f32 %v628_v12 }
 0x3aa   :  { %v2908_v14 = vpop.eup %2907 }
 0x3ab   :  { %v569_v31 = vsub.f32 1.0, %v2908_v14  ;;  %v575_v35 = vmul.f32 %v2908_v14, %v3291_v38 }
 0x3ae   :  { %v2910_v19 = vpop.eup %2909 }
 0x3af   :  { %v642_v43 = vsub.f32 1.0, %v2910_v19  ;;  %v648_v46 = vmul.f32 %v2910_v19, %v3295_v51 }
 0x3fb   :  { %v560_v15 = vpop.permute.xlu0 %559 }
 0x3fc   :  { %v562_v16 = vmul.f32 %v2908_v14, %v560_v15 }
 0x3fe   :  { %564 = vrot.lane.b32.xlu0 %v562_v16, %s3035_s25 }
 0x3ff   :  { %v633_v20 = vpop.permute.xlu1 %632 }
 0x400   :  { %v635_v21 = vmul.f32 %v2910_v19, %v633_v20 }
 0x402   :  { %637 = vrot.lane.b32.xlu1 %v635_v21, %s3035_s25 }
 0x470   :  { %v565_v23 = vpop.permute.xlu0 %564 }
 0x471   :  { %v567_v24 = vadd.f32 %v565_v23, %v3251_v32 }
 0x473   :  { %2911 = vtanh.f32 %v567_v24 }
 0x474   :  { %v638_v25 = vpop.permute.xlu1 %637 }
 0x475   :  { %v640_v27 = vadd.f32 %v638_v25, %v3257_v37 }
 0x477   :  { %2913 = vtanh.f32 %v640_v27 }
 0x480   :  { %v2912_v28 = vpop.eup %2911 }
 0x481   :  { %571 = vrot.lane.b32.xlu0 %v2912_v28, %s3036_s8 }
 0x484   :  { %v2914_v30 = vpop.eup %2913 }
 0x485   :  { %644 = vrot.lane.b32.xlu1 %v2914_v30, %s3036_s8 }
 0x4f3   :  { %v572_v34 = vpop.permute.xlu0 %571 }
 0x4f4   :  { %v574_v39 = vmul.f32 %v572_v34, %v569_v31 }
 0x4f6   :  { %v3328_v42 = vadd.f32 %v575_v35, %v574_v39 }
 0x4f7   :  { %v645_v32 = vpop.permute.xlu1 %644 }
 0x4f8   :  { %v647_v47 = vmul.f32 %v645_v32, %v642_v43  ;;  %v650_v37 = vpack.c.bf16 %v3328_v42, %v3328_v42 }
 0x4fa   :  { %v3333_v52 = vadd.f32 %v648_v46, %v647_v47  ;;  %652 = vrot.lane.b32.xlu0 %v650_v37, %s3036_s8 }
 0x4fc   :  { %v723_v54 = vpack.c.bf16 %v3333_v52, %v3333_v52 }
 0x4fe   :  { %725 = vrot.lane.b32.xlu1 %v723_v54, %s3036_s8 }
 0x56c   :  { %v653_v56 = vpop.permute.xlu0 %652 }
 0x56d   :  { %2611 = vmatmul.mubr.msk.bf16.vlgmr.msra.gmra.mxu0 %vm350_vm3, %v653_v56 }
 0x56e   :  { %2623 = vmatpush3.bf16.msra.mxu0 %v3171_v8  ;;  %2626 = vmatprep.mubr.msk.bf16.mxu0 %vm3033_vm2, %v3032_v10 }
 0x56f   :  { %2624 = vmatprep.subr.bf16.mxu0 %v3032_v10 }
 0x570   :  { %v726_v57 = vpop.permute.xlu1 %725 }
 0x571   :  { %2619 = vmatmul.mubr.msk.bf16.vlgmr.msra.gmra.mxu1 %vm350_vm3, %v726_v57 }
 0x572   :  { %2625 = vmatpush3.bf16.msra.mxu0 %v3191_v13  ;;  %2631 = vmatpush3.bf16.msra.mxu1 %v3208_v17 }
 0x573   :  { %2632 = vmatprep.subr.bf16.mxu1 %v3032_v10  ;;  %2634 = vmatprep.mubr.msk.bf16.mxu1 %vm3033_vm2, %v3032_v10 }
 0x574   :  { %2638 = vmatprep.subr.bf16.mxu0 %v3032_v10 }
 0x576   :  { %2633 = vmatpush3.bf16.msra.mxu1 %v3214_v18 }
 0x577   :  { %2646 = vmatprep.subr.bf16.mxu1 %v3032_v10 }
 0x62d   :  { %v691_v58 = vpop.f32.mrf.mxu0 }
 0x62e   :  { %v692_v59 = vadd.f32 %v3270_v48, %v691_v58 }
 0x62f   :  { %v2612_v60 = vpop.f32.mrf.mxu0 }
 0x630   :  { %705 = vrot.lane.b32.xlu0 %v692_v59, %s3035_s25  ;;  %v697_v4 = vadd.f32 %v692_v59, %v3242_v22 }
 0x631   :  { %v694_v61 = vpop.f32.mrf.mxu0  ;;  %v764_v62 = vpop.f32.mrf.mxu1 }
 0x632   :  { %v765_v63 = vadd.f32 %v3279_v53, %v764_v62  ;;  %v2397_v5 = vmul.f32 -1.442695, %v697_v4 }
 0x633   :  { %v2613_v0 = vpop.f32.mrf.mxu0  ;;  %v2620_v1 = vpop.f32.mrf.mxu1 }
 0x634   :  { %778 = vrot.lane.b32.xlu1 %v765_v63, %s3035_s25  ;;  %v770_v6 = vadd.f32 %v765_v63, %v3247_v26  ;;  %2915 = vpow2.f32 %v2397_v5 }
 0x635   :  { %v767_v2 = vpop.f32.mrf.mxu1 }
 0x636   :  { %v2399_v7 = vmul.f32 -1.442695, %v770_v6 }
 0x637   :  { %v2621_v3 = vpop.f32.mrf.mxu1 }
 0x638   :  { %2917 = vpow2.f32 %v2399_v7 }
 0x641   :  { %v2916_v9 = vpop.eup %2915 }
 0x642   :  { %v701_v11 = vadd.f32 1.0, %v2916_v9 }
 0x644   :  { %2919 = vrcp.f32 %v701_v11 }
 0x645   :  { %v2918_v12 = vpop.eup %2917 }
 0x646   :  { %v774_v14 = vadd.f32 1.0, %v2918_v12 }
 0x648   :  { %2921 = vrcp.f32 %v774_v14 }
 0x651   :  { %v2920_v15 = vpop.eup %2919 }
 0x652   :  { %v715_v34 = vsub.f32 1.0, %v2920_v15  ;;  %v721_v39 = vmul.f32 %v2920_v15, %v3328_v42 }
 0x655   :  { %v2922_v20 = vpop.eup %2921 }
 0x656   :  { %v788_v46 = vsub.f32 1.0, %v2922_v20  ;;  %v794_v47 = vmul.f32 %v2922_v20, %v3333_v52 }
 0x6a2   :  { %v706_v16 = vpop.permute.xlu0 %705 }
 0x6a3   :  { %v708_v19 = vmul.f32 %v2920_v15, %v706_v16 }
 0x6a5   :  { %710 = vrot.lane.b32.xlu0 %v708_v19, %s3035_s25 }
 0x6a6   :  { %v779_v21 = vpop.permute.xlu1 %778 }
 0x6a7   :  { %v781_v23 = vmul.f32 %v2922_v20, %v779_v21 }
 0x6a9   :  { %783 = vrot.lane.b32.xlu1 %v781_v23, %s3035_s25 }
 0x717   :  { %v711_v24 = vpop.permute.xlu0 %710 }
 0x718   :  { %v713_v25 = vadd.f32 %v711_v24, %v3242_v22 }
 0x71a   :  { %2923 = vtanh.f32 %v713_v25 }
 0x71b   :  { %v784_v27 = vpop.permute.xlu1 %783 }
 0x71c   :  { %v786_v28 = vadd.f32 %v784_v27, %v3247_v26 }
 0x71e   :  { %2925 = vtanh.f32 %v786_v28 }
 0x727   :  { %v2924_v30 = vpop.eup %2923 }
 0x728   :  { %717 = vrot.lane.b32.xlu0 %v2924_v30, %s3036_s8 }
 0x72b   :  { %v2926_v31 = vpop.eup %2925 }
 0x72c   :  { %790 = vrot.lane.b32.xlu1 %v2926_v31, %s3036_s8 }
 0x79a   :  { %v718_v35 = vpop.permute.xlu0 %717 }
 0x79b   :  { %v720_v43 = vmul.f32 %v718_v35, %v715_v34 }
 0x79d   :  { %v3366_v32 = vadd.f32 %v721_v39, %v720_v43 }
 0x79e   :  { %v791_v22 = vpop.permute.xlu1 %790 }
 0x79f   :  { %v793_v37 = vmul.f32 %v791_v22, %v788_v46  ;;  %v796_v26 = vpack.c.bf16 %v3366_v32, %v3366_v32 }
 0x7a1   :  { %v3371_v54 = vadd.f32 %v794_v47, %v793_v37  ;;  %798 = vrot.lane.b32.xlu0 %v796_v26, %s3036_s8 }
 0x7a3   :  { %v869_v56 = vpack.c.bf16 %v3371_v54, %v3371_v54 }
 0x7a5   :  { %871 = vrot.lane.b32.xlu1 %v869_v56, %s3036_s8 }
 0x813   :  { %v799_v57 = vpop.permute.xlu0 %798 }
 0x814   :  { %2627 = vmatmul.mubr.msk.bf16.vlgmr.msra.gmra.mxu0 %vm350_vm3, %v799_v57 }
 0x815   :  { %2639 = vmatpush3.bf16.msra.mxu0 %v3171_v8  ;;  %2642 = vmatprep.mubr.msk.bf16.mxu0 %vm3033_vm2, %v3032_v10 }
 0x816   :  { %2640 = vmatprep.subr.bf16.mxu0 %v3032_v10 }
 0x817   :  { %v872_v58 = vpop.permute.xlu1 %871 }
 0x818   :  { %2635 = vmatmul.mubr.msk.bf16.vlgmr.msra.gmra.mxu1 %vm350_vm3, %v872_v58 }
 0x819   :  { %2641 = vmatpush3.bf16.msra.mxu0 %v3191_v13  ;;  %2647 = vmatpush3.bf16.msra.mxu1 %v3208_v17 }
 0x81a   :  { %2648 = vmatprep.subr.bf16.mxu1 %v3032_v10  ;;  %2650 = vmatprep.mubr.msk.bf16.mxu1 %vm3033_vm2, %v3032_v10 }
 0x81b   :  { %2654 = vmatprep.subr.bf16.mxu0 %v3032_v10 }
 0x81d   :  { %2649 = vmatpush3.bf16.msra.mxu1 %v3214_v18 }
 0x81e   :  { %2662 = vmatprep.subr.bf16.mxu1 %v3032_v10 }
 0x8d4   :  { %v837_v59 = vpop.f32.mrf.mxu0 }
 0x8d5   :  { %v838_v60 = vadd.f32 %v3270_v48, %v837_v59 }
 0x8d6   :  { %v2628_v61 = vpop.f32.mrf.mxu0 }
 0x8d7   :  { %851 = vrot.lane.b32.xlu0 %v838_v60, %s3035_s25  ;;  %v843_v5 = vadd.f32 %v838_v60, %v3249_v29 }
 0x8d8   :  { %v840_v62 = vpop.f32.mrf.mxu0  ;;  %v910_v63 = vpop.f32.mrf.mxu1 }
 0x8d9   :  { %v911_v0 = vadd.f32 %v3279_v53, %v910_v63  ;;  %v2401_v6 = vmul.f32 -1.442695, %v843_v5 }
 0x8da   :  { %v2629_v1 = vpop.f32.mrf.mxu0  ;;  %v2636_v2 = vpop.f32.mrf.mxu1 }
 0x8db   :  { %924 = vrot.lane.b32.xlu1 %v911_v0, %s3035_s25  ;;  %v916_v7 = vadd.f32 %v911_v0, %v3253_v33  ;;  %2927 = vpow2.f32 %v2401_v6 }
 0x8dc   :  { %v913_v3 = vpop.f32.mrf.mxu1 }
 0x8dd   :  { %v2403_v9 = vmul.f32 -1.442695, %v916_v7 }
 0x8de   :  { %v2637_v4 = vpop.f32.mrf.mxu1 }
 0x8df   :  { %2929 = vpow2.f32 %v2403_v9 }
 0x8e8   :  { %v2928_v11 = vpop.eup %2927 }
 0x8e9   :  { %v847_v12 = vadd.f32 1.0, %v2928_v11 }
 0x8eb   :  { %2931 = vrcp.f32 %v847_v12 }
 0x8ec   :  { %v2930_v14 = vpop.eup %2929 }
 0x8ed   :  { %v920_v15 = vadd.f32 1.0, %v2930_v14 }
 0x8ef   :  { %2933 = vrcp.f32 %v920_v15 }
 0x8f8   :  { %v2932_v16 = vpop.eup %2931 }
 0x8f9   :  { %v861_v35 = vsub.f32 1.0, %v2932_v16  ;;  %v867_v43 = vmul.f32 %v2932_v16, %v3366_v32 }
 0x8fc   :  { %v2934_v21 = vpop.eup %2933 }
 0x8fd   :  { %v934_v47 = vsub.f32 1.0, %v2934_v21  ;;  %v940_v37 = vmul.f32 %v2934_v21, %v3371_v54 }
 0x949   :  { %v852_v19 = vpop.permute.xlu0 %851 }
 0x94a   :  { %v854_v20 = vmul.f32 %v2932_v16, %v852_v19 }
 0x94c   :  { %856 = vrot.lane.b32.xlu0 %v854_v20, %s3035_s25 }
 0x94d   :  { %v925_v23 = vpop.permute.xlu1 %924 }
 0x94e   :  { %v927_v24 = vmul.f32 %v2934_v21, %v925_v23 }
 0x950   :  { %929 = vrot.lane.b32.xlu1 %v927_v24, %s3035_s25 }
 0x9be   :  { %v857_v25 = vpop.permute.xlu0 %856 }
 0x9bf   :  { %v859_v27 = vadd.f32 %v857_v25, %v3249_v29 }
 0x9c1   :  { %2935 = vtanh.f32 %v859_v27 }
 0x9c2   :  { %v930_v28 = vpop.permute.xlu1 %929 }
 0x9c3   :  { %v932_v30 = vadd.f32 %v930_v28, %v3253_v33 }
 0x9c5   :  { %2937 = vtanh.f32 %v932_v30 }
 0x9ce   :  { %v2936_v31 = vpop.eup %2935 }
 0x9cf   :  { %863 = vrot.lane.b32.xlu0 %v2936_v31, %s3036_s8 }
 0x9d2   :  { %v2938_v34 = vpop.eup %2937 }
 0x9d3   :  { %936 = vrot.lane.b32.xlu1 %v2938_v34, %s3036_s8 }
 0xa41   :  { %v864_v39 = vpop.permute.xlu0 %863 }
 0xa42   :  { %v866_v46 = vmul.f32 %v864_v39, %v861_v35 }
 0xa44   :  { %v3404_v22 = vadd.f32 %v867_v43, %v866_v46 }
 0xa45   :  { %v937_v29 = vpop.permute.xlu1 %936 }
 0xa46   :  { %v939_v26 = vmul.f32 %v937_v29, %v934_v47  ;;  %v942_v33 = vpack.c.bf16 %v3404_v22, %v3404_v22 }
 0xa48   :  { %v3409_v56 = vadd.f32 %v940_v37, %v939_v26  ;;  %944 = vrot.lane.b32.xlu0 %v942_v33, %s3036_s8 }
 0xa4a   :  { %v1015_v57 = vpack.c.bf16 %v3409_v56, %v3409_v56 }
 0xa4c   :  { %1017 = vrot.lane.b32.xlu1 %v1015_v57, %s3036_s8 }
 0xaba   :  { %v945_v58 = vpop.permute.xlu0 %944 }
 0xabb   :  { %2643 = vmatmul.mubr.msk.bf16.vlgmr.msra.gmra.mxu0 %vm350_vm3, %v945_v58 }
 0xabc   :  { %2655 = vmatpush3.bf16.msra.mxu0 %v3171_v8  ;;  %2658 = vmatprep.mubr.msk.bf16.mxu0 %vm3033_vm2, %v3032_v10 }
 0xabd   :  { %2656 = vmatprep.subr.bf16.mxu0 %v3032_v10 }
 0xabe   :  { %v1018_v59 = vpop.permute.xlu1 %1017 }
 0xabf   :  { %2651 = vmatmul.mubr.msk.bf16.vlgmr.msra.gmra.mxu1 %vm350_vm3, %v1018_v59 }
 0xac0   :  { %2657 = vmatpush3.bf16.msra.mxu0 %v3191_v13  ;;  %2663 = vmatpush3.bf16.msra.mxu1 %v3208_v17 }
 0xac1   :  { %2664 = vmatprep.subr.bf16.mxu1 %v3032_v10  ;;  %2666 = vmatprep.mubr.msk.bf16.mxu1 %vm3033_vm2, %v3032_v10 }
 0xac2   :  { %2670 = vmatprep.subr.bf16.mxu0 %v3032_v10 }
 0xac4   :  { %2665 = vmatpush3.bf16.msra.mxu1 %v3214_v18 }
 0xac5   :  { %2678 = vmatprep.subr.bf16.mxu1 %v3032_v10 }
 0xb7b   :  { %v983_v60 = vpop.f32.mrf.mxu0 }
 0xb7c   :  { %v984_v61 = vadd.f32 %v3270_v48, %v983_v60 }
 0xb7d   :  { %v2644_v62 = vpop.f32.mrf.mxu0 }
 0xb7e   :  { %997 = vrot.lane.b32.xlu0 %v984_v61, %s3035_s25  ;;  %v989_v6 = vadd.f32 %v984_v61, %v3259_v40 }
 0xb7f   :  { %v986_v63 = vpop.f32.mrf.mxu0  ;;  %v1056_v0 = vpop.f32.mrf.mxu1 }
 0xb80   :  { %v1057_v1 = vadd.f32 %v3279_v53, %v1056_v0  ;;  %v2405_v7 = vmul.f32 -1.442695, %v989_v6 }
 0xb81   :  { %v2645_v2 = vpop.f32.mrf.mxu0  ;;  %v2652_v3 = vpop.f32.mrf.mxu1 }
 0xb82   :  { %1070 = vrot.lane.b32.xlu1 %v1057_v1, %s3035_s25  ;;  %v1062_v9 = vadd.f32 %v1057_v1, %v3265_v45  ;;  %2939 = vpow2.f32 %v2405_v7 }
 0xb83   :  { %v1059_v4 = vpop.f32.mrf.mxu1 }
 0xb84   :  { %v2407_v11 = vmul.f32 -1.442695, %v1062_v9 }
 0xb85   :  { %v2653_v5 = vpop.f32.mrf.mxu1 }
 0xb86   :  { %2941 = vpow2.f32 %v2407_v11 }
 0xb8f   :  { %v2940_v12 = vpop.eup %2939 }
 0xb90   :  { %v993_v14 = vadd.f32 1.0, %v2940_v12 }
 0xb92   :  { %2943 = vrcp.f32 %v993_v14 }
 0xb93   :  { %v2942_v15 = vpop.eup %2941 }
 0xb94   :  { %v1066_v16 = vadd.f32 1.0, %v2942_v15 }
 0xb96   :  { %2945 = vrcp.f32 %v1066_v16 }
 0xb9f   :  { %v2944_v19 = vpop.eup %2943 }
 0xba0   :  { %v1007_v39 = vsub.f32 1.0, %v2944_v19  ;;  %v1013_v46 = vmul.f32 %v2944_v19, %v3404_v22 }
 0xba3   :  { %v2946_v23 = vpop.eup %2945 }
 0xba4   :  { %v1080_v37 = vsub.f32 1.0, %v2946_v23  ;;  %v1086_v26 = vmul.f32 %v2946_v23, %v3409_v56 }
 0xbf0   :  { %v998_v20 = vpop.permute.xlu0 %997 }
 0xbf1   :  { %v1000_v21 = vmul.f32 %v2944_v19, %v998_v20 }
 0xbf3   :  { %1002 = vrot.lane.b32.xlu0 %v1000_v21, %s3035_s25 }
 0xbf4   :  { %v1071_v24 = vpop.permute.xlu1 %1070 }
 0xbf5   :  { %v1073_v25 = vmul.f32 %v2946_v23, %v1071_v24 }
 0xbf7   :  { %1075 = vrot.lane.b32.xlu1 %v1073_v25, %s3035_s25 }
 0xc65   :  { %v1003_v27 = vpop.permute.xlu0 %1002 }
 0xc66   :  { %v1005_v28 = vadd.f32 %v1003_v27, %v3259_v40 }
 0xc68   :  { %2947 = vtanh.f32 %v1005_v28 }
 0xc69   :  { %v1076_v30 = vpop.permute.xlu1 %1075 }
 0xc6a   :  { %v1078_v31 = vadd.f32 %v1076_v30, %v3265_v45 }
 0xc6c   :  { %2949 = vtanh.f32 %v1078_v31 }
 0xc75   :  { %v2948_v34 = vpop.eup %2947 }
 0xc76   :  { %1009 = vrot.lane.b32.xlu0 %v2948_v34, %s3036_s8 }
 0xc79   :  { %v2950_v35 = vpop.eup %2949 }
 0xc7a   :  { %1082 = vrot.lane.b32.xlu1 %v2950_v35, %s3036_s8 }
 0xce8   :  { %v1010_v43 = vpop.permute.xlu0 %1009 }
 0xce9   :  { %v1012_v47 = vmul.f32 %v1010_v43, %v1007_v39 }
 0xceb   :  { %v3442_v29 = vadd.f32 %v1013_v46, %v1012_v47 }
 0xcec   :  { %v1083_v40 = vpop.permute.xlu1 %1082 }
 0xced   :  { %v1085_v33 = vmul.f32 %v1083_v40, %v1080_v37  ;;  %v1088_v45 = vpack.c.bf16 %v3442_v29, %v3442_v29 }
 0xcef   :  { %v3447_v57 = vadd.f32 %v1086_v26, %v1085_v33  ;;  %1090 = vrot.lane.b32.xlu0 %v1088_v45, %s3036_s8 }
 0xcf1   :  { %v1161_v58 = vpack.c.bf16 %v3447_v57, %v3447_v57 }
 0xcf3   :  { %1163 = vrot.lane.b32.xlu1 %v1161_v58, %s3036_s8 }
 0xd61   :  { %v1091_v59 = vpop.permute.xlu0 %1090 }
 0xd62   :  { %2659 = vmatmul.mubr.msk.bf16.vlgmr.msra.gmra.mxu0 %vm350_vm3, %v1091_v59 }
 0xd63   :  { %2671 = vmatpush3.bf16.msra.mxu0 %v3171_v8  ;;  %2674 = vmatprep.mubr.msk.bf16.mxu0 %vm3033_vm2, %v3032_v10 }
 0xd64   :  { %2672 = vmatprep.subr.bf16.mxu0 %v3032_v10 }
 0xd65   :  { %v1164_v60 = vpop.permute.xlu1 %1163 }
 0xd66   :  { %2667 = vmatmul.mubr.msk.bf16.vlgmr.msra.gmra.mxu1 %vm350_vm3, %v1164_v60  ;;  %v3009_v60 = vld [vmem:[%s4002_s6 + $0x8] sm:$0xff]  }
 0xd67   :  { %2673 = vmatpush3.bf16.msra.mxu0 %v3191_v13  ;;  %2679 = vmatpush3.bf16.msra.mxu1 %v3208_v17 }
 0xd68   :  { %2680 = vmatprep.subr.bf16.mxu1 %v3032_v10  ;;  %2682 = vmatprep.mubr.msk.bf16.mxu1 %vm3033_vm2, %v3032_v10 }
 0xd69   :  { %2686 = vmatprep.subr.bf16.mxu0 %v3032_v10 }
 0xd6b   :  { %2681 = vmatpush3.bf16.msra.mxu1 %v3214_v18 }
 0xd6c   :  { %2694 = vmatprep.subr.bf16.mxu1 %v3032_v10 }
 0xe22   :  { %v1129_v8 = vpop.f32.mrf.mxu0 }
 0xe23   :  { %v1130_v61 = vadd.f32 %v3270_v48, %v1129_v8 }
 0xe24   :  { %v2660_v62 = vpop.f32.mrf.mxu0 }
 0xe25   :  { %1143 = vrot.lane.b32.xlu0 %v1130_v61, %s3035_s25  ;;  %v1135_v6 = vadd.f32 %v1130_v61, %v3272_v49 }
 0xe26   :  { %v1132_v63 = vpop.f32.mrf.mxu0  ;;  %v1202_v0 = vpop.f32.mrf.mxu1 }
 0xe27   :  { %v1203_v1 = vadd.f32 %v3279_v53, %v1202_v0  ;;  %v2409_v7 = vmul.f32 -1.442695, %v1135_v6 }
 0xe28   :  { %v2661_v2 = vpop.f32.mrf.mxu0  ;;  %v2668_v3 = vpop.f32.mrf.mxu1 }
 0xe29   :  { %1216 = vrot.lane.b32.xlu1 %v1203_v1, %s3035_s25  ;;  %v1208_v9 = vadd.f32 %v1203_v1, %v3282_v55  ;;  %2951 = vpow2.f32 %v2409_v7 }
 0xe2a   :  { %v1205_v4 = vpop.f32.mrf.mxu1 }
 0xe2b   :  { %v2411_v11 = vmul.f32 -1.442695, %v1208_v9 }
 0xe2c   :  { %v2669_v5 = vpop.f32.mrf.mxu1 }
 0xe2d   :  { %2953 = vpow2.f32 %v2411_v11 }
 0xe36   :  { %v2952_v12 = vpop.eup %2951 }
 0xe37   :  { %v1139_v14 = vadd.f32 1.0, %v2952_v12 }
 0xe39   :  { %2955 = vrcp.f32 %v1139_v14 }
 0xe3a   :  { %v2954_v15 = vpop.eup %2953 }
 0xe3b   :  { %v1212_v16 = vadd.f32 1.0, %v2954_v15 }
 0xe3d   :  { %2957 = vrcp.f32 %v1212_v16 }
 0xe46   :  { %v2956_v19 = vpop.eup %2955 }
 0xe47   :  { %v1153_v39 = vsub.f32 1.0, %v2956_v19  ;;  %v1159_v46 = vmul.f32 %v2956_v19, %v3442_v29 }
 0xe4a   :  { %v2958_v23 = vpop.eup %2957 }
 0xe4b   :  { %v1226_v40 = vsub.f32 1.0, %v2958_v23  ;;  %v1232_v26 = vmul.f32 %v2958_v23, %v3447_v57 }
 0xe97   :  { %v1144_v20 = vpop.permute.xlu0 %1143 }
 0xe98   :  { %v1146_v21 = vmul.f32 %v2956_v19, %v1144_v20 }
 0xe9a   :  { %1148 = vrot.lane.b32.xlu0 %v1146_v21, %s3035_s25 }
 0xe9b   :  { %v1217_v24 = vpop.permute.xlu1 %1216 }
 0xe9c   :  { %v1219_v25 = vmul.f32 %v2958_v23, %v1217_v24 }
 0xe9e   :  { %1221 = vrot.lane.b32.xlu1 %v1219_v25, %s3035_s25 }
 0xf0c   :  { %v1149_v27 = vpop.permute.xlu0 %1148 }
 0xf0d   :  { %v1151_v28 = vadd.f32 %v1149_v27, %v3272_v49 }
 0xf0f   :  { %2959 = vtanh.f32 %v1151_v28 }
 0xf10   :  { %v1222_v30 = vpop.permute.xlu1 %1221 }
 0xf11   :  { %v1224_v31 = vadd.f32 %v1222_v30, %v3282_v55 }
 0xf13   :  { %2961 = vtanh.f32 %v1224_v31 }
 0xf1c   :  { %v2960_v34 = vpop.eup %2959 }
 0xf1d   :  { %1155 = vrot.lane.b32.xlu0 %v2960_v34, %s3036_s8 }
 0xf20   :  { %v2962_v35 = vpop.eup %2961 }
 0xf21   :  { %1228 = vrot.lane.b32.xlu1 %v2962_v35, %s3036_s8 }
 0xf8f   :  { %v1156_v43 = vpop.permute.xlu0 %1155 }
 0xf90   :  { %v1158_v47 = vmul.f32 %v1156_v43, %v1153_v39 }
 0xf92   :  { %v3480_v37 = vadd.f32 %v1159_v46, %v1158_v47 }
 0xf93   :  { %v1229_v49 = vpop.permute.xlu1 %1228 }
 0xf94   :  { %v1231_v33 = vmul.f32 %v1229_v49, %v1226_v40  ;;  %v1234_v55 = vpack.c.bf16 %v3480_v37, %v3480_v37 }
 0xf96   :  { %v3485_v45 = vadd.f32 %v1232_v26, %v1231_v33  ;;  %1236 = vrot.lane.b32.xlu0 %v1234_v55, %s3036_s8 }
 0xf98   :  { %v1307_v58 = vpack.c.bf16 %v3485_v45, %v3485_v45 }
 0xf9a   :  { %1309 = vrot.lane.b32.xlu1 %v1307_v58, %s3036_s8 }
0x1008   :  { %v1237_v59 = vpop.permute.xlu0 %1236 }
0x1009   :  { %2675 = vmatmul.mubr.msk.bf16.vlgmr.msra.gmra.mxu0 %vm350_vm3, %v1237_v59 }
0x100a   :  { %2687 = vmatpush3.bf16.msra.mxu0 %v3009_v60  ;;  %2690 = vmatprep.mubr.msk.bf16.mxu0 %vm3033_vm2, %v3032_v10 }
0x100b   :  { %2688 = vmatprep.subr.bf16.mxu0 %v3032_v10 }
0x100c   :  { %v1310_v8 = vpop.permute.xlu1 %1309 }
0x100d   :  { %2683 = vmatmul.mubr.msk.bf16.vlgmr.msra.gmra.mxu1 %vm350_vm3, %v1310_v8 }
0x100e   :  { %2689 = vmatpush3.bf16.msra.mxu0 %v3191_v13  ;;  %2695 = vmatpush3.bf16.msra.mxu1 %v3208_v17 }
0x100f   :  { %2696 = vmatprep.subr.bf16.mxu1 %v3032_v10  ;;  %2698 = vmatprep.mubr.msk.bf16.mxu1 %vm3033_vm2, %v3032_v10 }
0x1012   :  { %2697 = vmatpush3.bf16.msra.mxu1 %v3214_v18 }
0x10c9   :  { %v1275_v61 = vpop.f32.mrf.mxu0 }
0x10ca   :  { %v1276_v62 = vadd.f32 %v3270_v48, %v1275_v61 }
0x10cb   :  { %v2676_v63 = vpop.f32.mrf.mxu0 }
0x10cc   :  { %1289 = vrot.lane.b32.xlu0 %v1276_v62, %s3035_s25  ;;  %v1281_v5 = vadd.f32 %v1276_v62, %v3255_v36 }
0x10cd   :  { %v1278_v0 = vpop.f32.mrf.mxu0  ;;  %v1348_v1 = vpop.f32.mrf.mxu1 }
0x10ce   :  { %v1349_v2 = vadd.f32 %v3279_v53, %v1348_v1  ;;  %v2413_v6 = vmul.f32 -1.442695, %v1281_v5 }
0x10cf   :  { %v2677_v13 = vpop.f32.mrf.mxu0  ;;  %v2684_v3 = vpop.f32.mrf.mxu1 }
0x10d0   :  { %1362 = vrot.lane.b32.xlu1 %v1349_v2, %s3035_s25  ;;  %v1354_v18 = vadd.f32 %v1349_v2, %v3261_v41  ;;  %2963 = vpow2.f32 %v2413_v6 }
0x10d1   :  { %v1351_v17 = vpop.f32.mrf.mxu1 }
0x10d2   :  { %v2415_v7 = vmul.f32 -1.442695, %v1354_v18 }
0x10d3   :  { %v2685_v4 = vpop.f32.mrf.mxu1 }
0x10d4   :  { %2965 = vpow2.f32 %v2415_v7 }
0x10dd   :  { %v2964_v9 = vpop.eup %2963 }
0x10de   :  { %v1285_v11 = vadd.f32 1.0, %v2964_v9 }
0x10e0   :  { %2967 = vrcp.f32 %v1285_v11 }
0x10e1   :  { %v2966_v12 = vpop.eup %2965 }
0x10e2   :  { %v1358_v14 = vadd.f32 1.0, %v2966_v12 }
0x10e4   :  { %2969 = vrcp.f32 %v1358_v14 }
0x10ed   :  { %v2968_v15 = vpop.eup %2967 }
0x10ee   :  { %v1299_v34 = vsub.f32 1.0, %v2968_v15  ;;  %v1305_v39 = vmul.f32 %v2968_v15, %v3480_v37 }
0x10f1   :  { %v2970_v20 = vpop.eup %2969 }
0x10f2   :  { %v1372_v47 = vsub.f32 1.0, %v2970_v20  ;;  %v1378_v40 = vmul.f32 %v2970_v20, %v3485_v45 }
0x113e   :  { %v1290_v16 = vpop.permute.xlu0 %1289 }
0x113f   :  { %v1292_v19 = vmul.f32 %v2968_v15, %v1290_v16  ;;  %v2885_v16 = vld [vmem:[%s4009_s13 + $0x18] sm:$0xff]  }
0x1140   :  { %2702 = vmatprep.subr.bf16.mxu0 %v2885_v16 }
0x1141   :  { %1294 = vrot.lane.b32.xlu0 %v1292_v19, %s3035_s25 }
0x1142   :  { %v1363_v21 = vpop.permute.xlu1 %1362 }
0x1143   :  { %v1365_v23 = vmul.f32 %v2970_v20, %v1363_v21  ;;  %v2886_v21 = vld [vmem:[%s4009_s13 + $0x10] sm:$0xff]  }
0x1145   :  { %1367 = vrot.lane.b32.xlu1 %v1365_v23, %s3035_s25 }
0x11b3   :  { %v1295_v24 = vpop.permute.xlu0 %1294 }
0x11b4   :  { %v1297_v25 = vadd.f32 %v1295_v24, %v3255_v36 }
0x11b6   :  { %2971 = vtanh.f32 %v1297_v25  ;;  %v2887_v25 = vld [vmem:[%s4009_s13 + $0x8] sm:$0xff]  }
0x11b7   :  { %v1368_v27 = vpop.permute.xlu1 %1367 }
0x11b8   :  { %v1370_v28 = vadd.f32 %v1368_v27, %v3261_v41 }
0x11ba   :  { %2973 = vtanh.f32 %v1370_v28 }
0x11c3   :  { %v2972_v30 = vpop.eup %2971 }
0x11c4   :  { %1301 = vrot.lane.b32.xlu0 %v2972_v30, %s3036_s8  ;;  %v2819_v30 = vpack.i.bf16 %v3480_v37, %v3442_v29 }
0x11c7   :  { %v2974_v31 = vpop.eup %2973 }
0x11c8   :  { %1374 = vrot.lane.b32.xlu1 %v2974_v31, %s3036_s8  ;;  %v2814_v31 = vpack.i.bf16 %v3404_v22, %v3366_v32 }
0x1236   :  { %v1302_v35 = vpop.permute.xlu0 %1301 }
0x1237   :  { %v1304_v43 = vmul.f32 %v1302_v35, %v1299_v34 }
0x1239   :  { %v3518_v46 = vadd.f32 %v1305_v39, %v1304_v43 }
0x123a   :  { %v1375_v36 = vpop.permute.xlu1 %1374 }
0x123b   :  { %v1377_v49 = vmul.f32 %v1375_v36, %v1372_v47  ;;  %v1380_v41 = vpack.c.bf16 %v3518_v46, %v3518_v46 }
0x123d   :  { %v3523_v26 = vadd.f32 %v1378_v40, %v1377_v49  ;;  %1382 = vrot.lane.b32.xlu0 %v1380_v41, %s3036_s8 }
0x123f   :  { %v1453_v33 = vpack.c.bf16 %v3523_v26, %v3523_v26 }
0x1241   :  { %1455 = vrot.lane.b32.xlu1 %v1453_v33, %s3036_s8 }
0x12af   :  { %v1383_v55 = vpop.permute.xlu0 %1382 }
0x12b0   :  { %2691 = vmatmul.mubr.msk.bf16.vlgmr.msra.gmra.mxu0 %vm350_vm3, %v1383_v55 }
0x12b1   :  { %2703 = vmatpush3.bf16.msra.mxu0 %v2885_v16 }
0x12b2   :  { %2704 = vmatprep.subr.bf16.mxu0 %v2886_v21 }
0x12b3   :  { %v1456_v58 = vpop.permute.xlu1 %1455 }
0x12b4   :  { %2699 = vmatmul.mubr.msk.bf16.vlgmr.msra.gmra.mxu1 %vm350_vm3, %v1456_v58 }
0x12b5   :  { %2705 = vmatpush3.bf16.msra.mxu0 %v2886_v21 }
0x12b6   :  { %2706 = vmatprep.subr.bf16.mxu0 %v2887_v25 }
0x12b9   :  { %2707 = vmatpush3.bf16.msra.mxu0 %v2887_v25 }
0x1370   :  { %v1421_v59 = vpop.f32.mrf.mxu0 }
0x1371   :  { %v1422_v60 = vadd.f32 %v3270_v48, %v1421_v59 }
0x1372   :  { %v2692_v8 = vpop.f32.mrf.mxu0 }
0x1373   :  { %1435 = vrot.lane.b32.xlu0 %v1422_v60, %s3035_s25  ;;  %v1427_v3 = vadd.f32 %v1422_v60, %v3263_v44 }
0x1374   :  { %v1424_v61 = vpop.f32.mrf.mxu0  ;;  %v1494_v62 = vpop.f32.mrf.mxu1 }
0x1375   :  { %v1495_v63 = vadd.f32 %v3279_v53, %v1494_v62  ;;  %v2417_v17 = vmul.f32 -1.442695, %v1427_v3 }
0x1376   :  { %v2693_v0 = vpop.f32.mrf.mxu0  ;;  %v2700_v1 = vpop.f32.mrf.mxu1 }
0x1377   :  { %1508 = vrot.lane.b32.xlu1 %v1495_v63, %s3035_s25  ;;  %v1500_v4 = vadd.f32 %v1495_v63, %v3274_v50  ;;  %2975 = vpow2.f32 %v2417_v17 }
0x1378   :  { %v1497_v2 = vpop.f32.mrf.mxu1 }
0x1379   :  { %v2419_v48 = vmul.f32 -1.442695, %v1500_v4  ;;  %v3598_v4 = vld [vmem:[%s4010_s14] ss:$0 sm:$0xff] }
0x137a   :  { %v2701_v13 = vpop.f32.mrf.mxu1 }
0x137b   :  { %2977 = vpow2.f32 %v2419_v48  ;;  %v3608_v48 = vld [vmem:[%s4028_s1 + $0x18] sm:$0xff] }
0x1384   :  { %v2976_v5 = vpop.eup %2975 }
0x1385   :  { %v1431_v6 = vadd.f32 1.0, %v2976_v5  ;;  %v3613_v5 = vld [vmem:[%s4029_s2 + $0x10] sm:$0xff] }
0x1387   :  { %2979 = vrcp.f32 %v1431_v6 }
0x1388   :  { %v2978_v18 = vpop.eup %2977 }
0x1389   :  { %v1504_v7 = vadd.f32 1.0, %v2978_v18 }
0x138b   :  { %2981 = vrcp.f32 %v1504_v7 }
0x1394   :  { %v2980_v53 = vpop.eup %2979 }
0x1395   :  { %v1445_v34 = vsub.f32 1.0, %v2980_v53  ;;  %v1451_v39 = vmul.f32 %v2980_v53, %v3518_v46 }
0x1398   :  { %v2982_v12 = vpop.eup %2981 }
0x1399   :  { %v1518_v43 = vsub.f32 1.0, %v2982_v12  ;;  %v1524_v49 = vmul.f32 %v2982_v12, %v3523_v26 }
0x13e5   :  { %v1436_v9 = vpop.permute.xlu0 %1435 }
0x13e6   :  { %v1438_v11 = vmul.f32 %v2980_v53, %v1436_v9  ;;  %v3622_v53 = vld [vmem:[%s4028_s1 + $0x8] sm:$0xff] }
0x13e8   :  { %1440 = vrot.lane.b32.xlu0 %v1438_v11, %s3035_s25 }
0x13e9   :  { %v1509_v14 = vpop.permute.xlu1 %1508 }
0x13ea   :  { %v1511_v15 = vmul.f32 %v2982_v12, %v1509_v14  ;;  %v3631_v12 = vld [vmem:[%s4029_s2 + $0x18] sm:$0xff]  ;;  %v2889_v14 = vld [vmem:[%s4011_s15 + $0x8] ss:$0 sps:$4 sm:$0xff]  }
0x13eb   :  { %2799 = vmatprep.subr.msk.bf16.mxu1 %vm126_vm0, %v2889_v14 }
0x13ec   :  { %1513 = vrot.lane.b32.xlu1 %v1511_v15, %s3035_s25  ;;  %v3639_v15 = vld [vmem:[%s4029_s2] sm:$0xff] }
0x145a   :  { %v1441_v19 = vpop.permute.xlu0 %1440 }
0x145b   :  { %v1443_v20 = vadd.f32 %v1441_v19, %v3263_v44  ;;  %v2888_v44 = vld [vmem:[%s4009_s13] sm:$0xff]   ;;  %v1714_v19 = vsub.f32 1.0, %v3608_v48 }
0x145c   :  { %2708 = vmatprep.subr.bf16.mxu0 %v2888_v44 }
0x145d   :  { %2983 = vtanh.f32 %v1443_v20  ;;  %2709 = vmatpush3.bf16.msra.mxu0 %v2888_v44  ;;  %v3645_v20 = vld [vmem:[%s4029_s2 + $0x8] sm:$0xff]  ;;  %v3661_v44 = vmul.f32 %v3608_v48, %v3631_v12 }
0x145e   :  { %v1514_v23 = vpop.permute.xlu1 %1513  ;;  %2740 = vmatprep.subr.mxu0 %v3032_v10 }
0x145f   :  { %v1516_v24 = vadd.f32 %v1514_v23, %v3274_v50  ;;  %v2809_v50 = vpack.i.bf16 %v3328_v42, %v3291_v38  ;;  %v1712_v23 = vsub.f32 1.0, %v3622_v53 }
0x1461   :  { %2985 = vtanh.f32 %v1516_v24 }
0x146a   :  { %v2984_v27 = vpop.eup %2983 }
0x146b   :  { %1447 = vrot.lane.b32.xlu0 %v2984_v27, %s3036_s8 }
0x146e   :  { %v2986_v28 = vpop.eup %2985 }
0x146f   :  { %2810 = vrot.lane.b32.xlu0 %v2809_v50, %s3036_s8  ;;  %1520 = vrot.lane.b32.xlu1 %v2986_v28, %s3036_s8  ;;  %v1853_v50 = vsel %vm126_vm0, %v2889_v14, 0 }
0x1470   :  { %2719 = vmatpush3.bf16.msra.mxu1 %v1853_v50 }
0x1473   :  { %2820 = vrot.lane.b32.xlu0 %v2819_v30, %s3036_s8  ;;  %2815 = vrot.lane.b32.xlu1 %v2814_v31, %s3036_s8 }
0x14dd   :  { %v1448_v35 = vpop.permute.xlu0 %1447 }
0x14de   :  { %v1450_v38 = vmul.f32 %v1448_v35, %v1445_v34  ;;  %v3676_v34 = vmul.f32 %v3622_v53, %v3645_v20  ;;  %v2890_v35 = vld [vmem:[%s4011_s15] sm:$0xff]   ;;  %s3037_s15 = smov 8  }
0x14df   :  { %2720 = vmatprep.subr.bf16.mxu1 %v2890_v35 }
0x14e0   :  { %v1452_v42 = vadd.f32 %v1451_v39, %v1450_v38  ;;  %2721 = vmatpush3.bf16.msra.mxu1 %v2890_v35 }
0x14e1   :  { %v2811_v47 = vpop.permute.xlu0 %2810  ;;  %v1521_v36 = vpop.permute.xlu1 %1520 }
0x14e2   :  { %v2813_v40 = vunpack.i.h.bf16 %v2811_v47  ;;  %v1523_v29 = vmul.f32 %v1521_v36, %v1518_v43  ;;  %v2824_v37 = vpack.i.bf16 %v1452_v42, %v3518_v46  ;;  %v2812_v32 = vunpack.i.l.bf16 %v2811_v47 }
0x14e4   :  { %v1525_v22 = vadd.f32 %v1524_v49, %v1523_v29  ;;  %2825 = vrot.lane.b32.xlu1 %v2824_v37, %s3036_s8  ;;  %v1559_v41 = vsel %vm350_vm3, %v2813_v40, %v3523_v26 }
0x14e5   :  { %v2821_v33 = vpop.permute.xlu0 %2820  ;;  %v2816_v55 = vpop.permute.xlu1 %2815 }
0x14e6   :  { %v1558_v58 = vsel %vm350_vm3, %v2812_v32, %v1525_v22  ;;  %v2823_v59 = vunpack.i.h.bf16 %v2821_v33  ;;  %v2822_v60 = vunpack.i.l.bf16 %v2821_v33  ;;  %v2818_v8 = vunpack.i.h.bf16 %v2816_v55  ;;  %v3702_v32 = vld [vmem:[%s4028_s1 + $0x30] sm:$0xff]  ;;  %v3712_v33 = vld [vmem:[%s4028_s1 + $0x38] sm:$0xff] }
0x14e7   :  { %v2817_v61 = vunpack.i.l.bf16 %v2816_v55  ;;  %v1566_v62 = vpack.c.bf16 %v1559_v41, %v1558_v58  ;;  %v3707_v41 = vld [vmem:[%s4028_s1 + $0x20] sm:$0xff]  ;;  %v1717_v58 = vsub.f32 1.0, %v3702_v32 }
0x14e8   :  { %v1562_v46 = vsel %vm350_vm3, %v2822_v60, %v3409_v56  ;;  %v1563_v63 = vsel %vm350_vm3, %v2823_v59, %v3371_v54  ;;  %v1561_v0 = vsel %vm350_vm3, %v2818_v8, %v3447_v57  ;;  %v3721_v60 = vld [vmem:[%s4028_s1 + $0x28] sm:$0xff]  ;;  %v3726_v8 = vld [vmem:[%s4029_s2 + $0x30] sm:$0xff] }
0x14e9   :  { %v1568_v26 = vpack.c.bf16 %v1563_v63, %v1562_v46  ;;  %v1560_v1 = vsel %vm350_vm3, %v2817_v61, %v3485_v45  ;;  %2710 = vmatprep.mubr.msk.bf16.mxu0 %vm1625_vm4, %v1566_v62  ;;  %v3593_v45 = vld [vmem:[%s4028_s1 + $0x10] sm:$0xff]  ;;  %v1715_v62 = vsub.f32 1.0, %v3707_v41  ;;  %v3735_v46 = vld [vmem:[%s4029_s2 + $0x38] sm:$0xff]  ;;  %v3740_v63 = vld [vmem:[%s4029_s2 + $0x20] sm:$0xff] }
0x14ea   :  { %v1567_v2 = vpack.c.bf16 %v1561_v0, %v1560_v1  ;;  %v1713_v18 = vsub.f32 1.0, %v3593_v45  ;;  %v3649_v21 = vmul.f32 %v3593_v45, %v3613_v5  ;;  %v2844_v29 = vpack.i.bf16 %v3608_v48, %v3593_v45  ;;  %v3746_v1 = vld [vmem:[%s4029_s2 + $0x28] sm:$0xff] }
0x14eb   :  { %v3775_v14 = vmul.f32 %v3721_v60, %v3746_v1 }
0x14ec   :  { %2711 = vmatmul.mubr.msk.bf16.vlgmr.msra.gmra.mxu0 %vm1625_vm4, %v1567_v2  ;;  %v1716_v2 = vsub.f32 1.0, %v3721_v60 }
0x14ed   :  { %2714 = vmatprep.mubr.msk.bf16.mxu0 %vm1625_vm4, %v1568_v26  ;;  %v1718_v26 = vsub.f32 1.0, %v3712_v33 }
0x1556   :  { %v2826_v13 = vpop.permute.xlu1 %2825 }
0x1557   :  { %v2828_v3 = vunpack.i.h.bf16 %v2826_v13  ;;  %v2827_v56 = vunpack.i.l.bf16 %v2826_v13  ;;  %v3751_v13 = vmul.f32 %v3702_v32, %v3726_v8 }
0x1559   :  { %v1565_v54 = vsel %vm350_vm3, %v2828_v3, %v3295_v51  ;;  %v1564_v57 = vsel %vm350_vm3, %v2827_v56, %v3333_v52  ;;  %v3603_v52 = vld [vmem:[%s4028_s1] sm:$0xff] }
0x155a   :  { %v1569_v17 = vpack.c.bf16 %v1565_v54, %v1564_v57  ;;  %v1711_v11 = vsub.f32 1.0, %v3603_v52  ;;  %v3666_v28 = vmul.f32 %v3603_v52, %v3639_v15  ;;  %v2839_v37 = vpack.i.bf16 %v3622_v53, %v3603_v52 }
0x155b   :  { %v3761_v54 = vmul.f32 %v3712_v33, %v3735_v46 }
0x155c   :  { %2715 = vmatmul.mubr.msk.bf16.gmra.mxu0 %vm1625_vm4, %v1569_v17  ;;  %v3765_v17 = vmul.f32 %v3707_v41, %v3740_v63 }
0x155d   :  { %2756 = vmatprep.mubr.msk.f32.mxu0 %vm3033_vm2, %v3032_v10 }
0x15ac   :  { %v2712_v51 = vpop.f32.mrf.mxu0 }
0x15ad   :  { %v3616_v6 = vadd.f32 %v2712_v51, %v3598_v4 }
0x15ae   :  { %v1672_v7 = vpop.f32.mrf.mxu0 }
0x15af   :  { %v3625_v9 = vadd.f32 %v3598_v4, %v1672_v7  ;;  %v1721_v24 = vmul.f32 %v1713_v18, %v3616_v6 }
0x15b0   :  { %v2713_v16 = vpop.f32.mrf.mxu0 }
0x15b1   :  { %v3657_v25 = vadd.f32 %v2713_v16, %v3598_v4  ;;  %v1719_v30 = vmul.f32 %v1711_v11, %v3625_v9  ;;  %v1729_v42 = vadd.f32 %v1721_v24, %v3649_v21 }
0x15b2   :  { %v1675_v27 = vpop.f32.mrf.mxu0 }
0x15b3   :  { %v3672_v31 = vadd.f32 %v3598_v4, %v1675_v27  ;;  %v1722_v39 = vmul.f32 %v1714_v19, %v3657_v25  ;;  %v1727_v47 = vadd.f32 %v1719_v30, %v3666_v28 }
0x15b5   :  { %v1720_v38 = vmul.f32 %v1712_v23, %v3672_v31  ;;  %v1730_v43 = vadd.f32 %v1722_v39, %v3661_v44 }
0x15b7   :  { %v1728_v36 = vadd.f32 %v1720_v38, %v3676_v34  ;;  %v2829_v40 = vpack.i.bf16 %v1730_v43, %v1729_v42  ;;  %v2864_v38 = vpack.i.bf16 %v3712_v33, %v3702_v32  ;;  %v2859_v42 = vpack.i.bf16 %v3721_v60, %v3707_v41 }
0x15b9   :  { %v2834_v49 = vpack.i.bf16 %v1728_v36, %v1727_v47  ;;  %2830 = vrot.lane.b32.xlu1 %v2829_v40, %s3037_s15 }
0x15bb   :  { %2835 = vrot.lane.b32.xlu0 %v2834_v49, %s3037_s15 }
0x15bd   :  { %2845 = vrot.lane.b32.xlu1 %v2844_v29, %s3038_s0 }
0x15bf   :  { %2840 = vrot.lane.b32.xlu0 %v2839_v37, %s3038_s0 }
0x161c   :  { %v2716_v22 = vpop.f32.mrf.mxu0 }
0x161d   :  { %v3715_v55 = vadd.f32 %v2716_v22, %v3598_v4 }
0x161e   :  { %v1688_v59 = vpop.f32.mrf.mxu0 }
0x161f   :  { %v3729_v61 = vadd.f32 %v3598_v4, %v1688_v59  ;;  %v1725_v3 = vmul.f32 %v1717_v58, %v3715_v55 }
0x1620   :  { %v2717_v0 = vpop.f32.mrf.mxu0 }
0x1621   :  { %v3757_v56 = vadd.f32 %v2717_v0, %v3598_v4  ;;  %v1723_v51 = vmul.f32 %v1715_v62, %v3729_v61  ;;  %v1733_v27 = vadd.f32 %v1725_v3, %v3751_v13 }
0x1622   :  { %v1691_v57 = vpop.f32.mrf.mxu0 }
0x1623   :  { %v3771_v7 = vadd.f32 %v3598_v4, %v1691_v57  ;;  %v1726_v16 = vmul.f32 %v1718_v26, %v3757_v56  ;;  %v1731_v30 = vadd.f32 %v1723_v51, %v3765_v17 }
0x1625   :  { %v1724_v24 = vmul.f32 %v1716_v2, %v3771_v7  ;;  %v1734_v50 = vadd.f32 %v1726_v16, %v3761_v54 }
0x1627   :  { %v1732_v4 = vadd.f32 %v1724_v24, %v3775_v14  ;;  %v2849_v35 = vpack.i.bf16 %v1734_v50, %v1733_v27 }
0x1629   :  { %v2854_v39 = vpack.i.bf16 %v1732_v4, %v1731_v30  ;;  %2850 = vrot.lane.b32.xlu1 %v2849_v35, %s3037_s15 }
0x162b   :  { %2855 = vrot.lane.b32.xlu0 %v2854_v39, %s3037_s15  ;;  %v2831_v43 = vpop.permute.xlu1 %2830 }
0x162c   :  { %v2833_v36 = vunpack.i.h.bf16 %v2831_v43  ;;  %v2832_v40 = vunpack.i.l.bf16 %v2831_v43 }
0x162d   :  { %v2836_v47 = vpop.permute.xlu0 %2835  ;;  %2865 = vrot.lane.b32.xlu1 %v2864_v38, %s3038_s0 }
0x162e   :  { %v2838_v49 = vunpack.i.h.bf16 %v2836_v47  ;;  %v2837_v29 = vunpack.i.l.bf16 %v2836_v47  ;;  %v1803_v3 = vsel %vm1799_vm5, %v3631_v12, %v2833_v36  ;;  %v1802_v57 = vsel %vm1799_vm5, %v3613_v5, %v2832_v40 }
0x162f   :  { %2860 = vrot.lane.b32.xlu0 %v2859_v42, %s3038_s0  ;;  %v2846_v37 = vpop.permute.xlu1 %2845  ;;  %v1932_v42 = vld [vmem:[%s4013_s17] sm:$0xf] }
0x1630   :  { %v2848_v22 = vunpack.i.h.bf16 %v2846_v37  ;;  %v2847_v59 = vunpack.i.l.bf16 %v2846_v37  ;;  %v1801_v24 = vsel %vm1799_vm5, %v3645_v20, %v2838_v49  ;;  %v1800_v27 = vsel %vm1799_vm5, %v3639_v15, %v2837_v29  ;;  %2800 = vmatprep.subr.msk.bf16.mxu1 %vm126_vm0, %v1932_v42 }
0x1631   :  { %v2841_v0 = vpop.permute.xlu0 %2840  ;;  %v1953_v43 = vsel %vm126_vm0, %v1932_v42, 0 }
0x1632   :  { %v2843_v51 = vunpack.i.h.bf16 %v2841_v0  ;;  %v2842_v16 = vunpack.i.l.bf16 %v2841_v0  ;;  %v1811_v50 = vsel %vm1808_vm6, %v1802_v57, %v2847_v59  ;;  %v1812_v30 = vsel %vm1808_vm6, %v1803_v3, %v2848_v22 }
0x1633   :  { %v1818_v38 = vpack.c.bf16 %v1812_v30, %v1811_v50 }
0x1634   :  { %v1809_v4 = vsel %vm1808_vm6, %v1800_v27, %v2842_v16  ;;  %v1810_v35 = vsel %vm1808_vm6, %v1801_v24, %v2843_v51 }
0x1635   :  { %v1817_v39 = vpack.c.bf16 %v1810_v35, %v1809_v4 }
0x1637   :  { %2722 = vmatprep.mubr.msk.bf16.mxu1 %vm113_vm1, %v1817_v39 }
0x1638   :  { %2723 = vmatmul.mubr.msk.bf16.vlgmr.msra.gmra.mxu1 %vm113_vm1, %v1818_v38 }
0x1639   :  { %2731 = vmatpush3.bf16.msra.mxu1 %v1953_v43 }
0x163a   :  { %2759 = vmatprep.subr.mxu1 %v3032_v10 }
0x169b   :  { %v2851_v47 = vpop.permute.xlu1 %2850 }
0x169c   :  { %v2853_v40 = vunpack.i.h.bf16 %v2851_v47  ;;  %v2852_v49 = vunpack.i.l.bf16 %v2851_v47  ;;  %v3832_v47 = vld [vmem:[%s4012_s16] ss:$0 sm:$0xff] }
0x169d   :  { %v2856_v36 = vpop.permute.xlu0 %2855 }
0x169e   :  { %v2858_v29 = vunpack.i.h.bf16 %v2856_v36  ;;  %v2857_v37 = vunpack.i.l.bf16 %v2856_v36  ;;  %v1807_v57 = vsel %vm1799_vm5, %v3735_v46, %v2853_v40  ;;  %v1806_v51 = vsel %vm1799_vm5, %v3726_v8, %v2852_v49 }
0x169f   :  { %v2866_v22 = vpop.permute.xlu1 %2865 }
0x16a0   :  { %v2868_v59 = vunpack.i.h.bf16 %v2866_v22  ;;  %v2867_v0 = vunpack.i.l.bf16 %v2866_v22  ;;  %v1805_v27 = vsel %vm1799_vm5, %v3746_v1, %v2858_v29  ;;  %v1804_v50 = vsel %vm1799_vm5, %v3740_v63, %v2857_v37 }
0x16a1   :  { %v2861_v3 = vpop.permute.xlu0 %2860 }
0x16a2   :  { %v2863_v16 = vunpack.i.h.bf16 %v2861_v3  ;;  %v2862_v24 = vunpack.i.l.bf16 %v2861_v3  ;;  %v1815_v30 = vsel %vm1808_vm6, %v1806_v51, %v2867_v0  ;;  %v1816_v4 = vsel %vm1808_vm6, %v1807_v57, %v2868_v59 }
0x16a3   :  { %v1820_v42 = vpack.c.bf16 %v1816_v4, %v1815_v30  ;;  %v2052_v0 = vsub.f32 %v3757_v56, %v3735_v46  ;;  %v2051_v3 = vsub.f32 %v3715_v55, %v3726_v8  ;;  %v2049_v4 = vsub.f32 %v3729_v61, %v3740_v63 }
0x16a4   :  { %v1813_v35 = vsel %vm1808_vm6, %v1804_v50, %v2862_v24  ;;  %v1814_v39 = vsel %vm1808_vm6, %v1805_v27, %v2863_v16  ;;  %v2050_v24 = vsub.f32 %v3771_v7, %v3746_v1  ;;  %v2048_v56 = vsub.f32 %v3657_v25, %v3631_v12 }
0x16a5   :  { %v1819_v38 = vpack.c.bf16 %v1814_v39, %v1813_v35  ;;  %v2060_v16 = vmul.f32 %v2052_v0, %v2052_v0  ;;  %v2059_v30 = vmul.f32 %v2051_v3, %v2051_v3  ;;  %v2047_v7 = vsub.f32 %v3616_v6, %v3613_v5 }
0x16a6   :  { %v2058_v55 = vmul.f32 %v2050_v24, %v2050_v24  ;;  %v2056_v61 = vmul.f32 %v2048_v56, %v2048_v56  ;;  %v2046_v25 = vsub.f32 %v3672_v31, %v3645_v20 }
0x16a7   :  { %2726 = vmatprep.mubr.msk.bf16.mxu1 %vm113_vm1, %v1819_v38  ;;  %v2068_v38 = vmul.f32 %v2060_v16, %v3712_v33 }
0x16a8   :  { %2727 = vmatmul.mubr.msk.bf16.gmra.mxu1 %vm113_vm1, %v1820_v42  ;;  %v2067_v42 = vmul.f32 %v2059_v30, %v3702_v32 }
0x16f8   :  { %v2724_v43 = vpop.f32.mrf.mxu1 }
0x16f9   :  { %v1898_v37 = vadd.f32 %v2724_v43, %v3832_v47  ;;  %v2057_v43 = vmul.f32 %v2049_v4, %v2049_v4 }
0x16fa   :  { %v1889_v36 = vpop.f32.mrf.mxu1 }
0x16fb   :  { %v1890_v40 = vadd.f32 %v3832_v47, %v1889_v36  ;;  %v2066_v36 = vmul.f32 %v2058_v55, %v3721_v60  ;;  %v2065_v6 = vmul.f32 %v2057_v43, %v3707_v41 }
0x16fc   :  { %v2725_v49 = vpop.f32.mrf.mxu1 }
0x16fd   :  { %v1901_v29 = vadd.f32 %v2725_v49, %v3832_v47  ;;  %2987 = vtanh.f32 %v1890_v40  ;;  %v2055_v40 = vmul.f32 %v2047_v7, %v2047_v7  ;;  %v2045_v49 = vsub.f32 %v3625_v9, %v3639_v15 }
0x16fe   :  { %v1892_v22 = vpop.f32.mrf.mxu1 }
0x16ff   :  { %v1893_v59 = vadd.f32 %v3832_v47, %v1892_v22  ;;  %2989 = vtanh.f32 %v1901_v29  ;;  %v2064_v29 = vmul.f32 %v2056_v61, %v3608_v48  ;;  %v2063_v31 = vmul.f32 %v2055_v40, %v3593_v45 }
0x1700   :  { %v2053_v22 = vmul.f32 %v2045_v49, %v2045_v49 }
0x1701   :  { %2991 = vtanh.f32 %v1893_v59 }
0x1702   :  { %2993 = vtanh.f32 %v1898_v37  ;;  %v2054_v37 = vmul.f32 %v2046_v25, %v2046_v25  ;;  %v2061_v9 = vmul.f32 %v2053_v22, %v3603_v52 }
0x1704   :  { %v2062_v59 = vmul.f32 %v2054_v37, %v3622_v53 }
0x170a   :  { %v2988_v57 = vpop.eup %2987 }
0x170c   :  { %v2990_v51 = vpop.eup %2989 }
0x170e   :  { %v2992_v27 = vpop.eup %2991 }
0x170f   :  { %v2994_v50 = vpop.eup %2993  ;;  %v1928_v35 = vpack.c.bf16 %v2992_v27, %v2988_v57 }
0x1710   :  { %v1929_v39 = vpack.c.bf16 %v2990_v51, %v2994_v50 }
0x1711   :  { %2732 = vmatprep.mubr.msk.bf16.mxu1 %vm1799_vm5, %v1928_v35 }
0x1712   :  { %2733 = vmatmul.mubr.msk.bf16.vlgmr.msra.gmra.mxu1 %vm1799_vm5, %v1929_v39 }
0x1713   :  { %2760 = vmatpush3.msra.mxu1 %v2068_v38 }
0x1714   :  { %2761 = vmatprep.subr.mxu1 %v3032_v10 }
0x1715   :  { %2762 = vmatpush3.msra.mxu1 %v2067_v42 }
0x1716   :  { %2763 = vmatprep.subr.mxu1 %v3032_v10 }
0x1717   :  { %2764 = vmatpush3.msra.mxu1 %v2066_v36 }
0x1718   :  { %2765 = vmatprep.subr.mxu1 %v3032_v10 }
0x1719   :  { %2766 = vmatpush3.msra.mxu1 %v2065_v6 }
0x171a   :  { %2767 = vmatprep.subr.mxu1 %v3032_v10 }
0x171b   :  { %2768 = vmatpush3.msra.mxu1 %v2064_v29 }
0x171c   :  { %2769 = vmatprep.subr.mxu1 %v3032_v10 }
0x171d   :  { %2770 = vmatpush3.msra.mxu1 %v2063_v31 }
0x171e   :  { %2771 = vmatprep.subr.mxu1 %v3032_v10 }
0x171f   :  { %2772 = vmatpush3.msra.mxu1 %v2062_v59 }
0x1720   :  { %2773 = vmatprep.subr.mxu1 %v3032_v10 }
0x1721   :  { %2774 = vmatpush3.msra.mxu1 %v2061_v9 }
0x1768   :  { %v2728_v0 = vpop.f32.mrf.mxu1 }
0x1769   :  { %v1914_v24 = vadd.f32 %v2728_v0, %v3832_v47 }
0x176a   :  { %v1905_v3 = vpop.f32.mrf.mxu1 }
0x176b   :  { %v1906_v57 = vadd.f32 %v3832_v47, %v1905_v3 }
0x176c   :  { %v2729_v51 = vpop.f32.mrf.mxu1 }
0x176d   :  { %v1917_v16 = vadd.f32 %v2729_v51, %v3832_v47  ;;  %2995 = vtanh.f32 %v1906_v57 }
0x176e   :  { %v1908_v27 = vpop.f32.mrf.mxu1 }
0x176f   :  { %v1909_v50 = vadd.f32 %v3832_v47, %v1908_v27  ;;  %2997 = vtanh.f32 %v1917_v16  ;;  %v2436_v47 = vld [vmem:[%s4014_s18] ss:$0 sm:$0xff] }
0x1771   :  { %2999 = vtanh.f32 %v1909_v50 }
0x1772   :  { %3001 = vtanh.f32 %v1914_v24 }
0x177a   :  { %v2996_v30 = vpop.eup %2995 }
0x177c   :  { %v2998_v4 = vpop.eup %2997 }
0x177e   :  { %v3000_v35 = vpop.eup %2999 }
0x177f   :  { %v3002_v39 = vpop.eup %3001  ;;  %v1930_v56 = vpack.c.bf16 %v3000_v35, %v2996_v30 }
0x1780   :  { %v1931_v38 = vpack.c.bf16 %v2998_v4, %v3002_v39 }
0x1781   :  { %2736 = vmatprep.mubr.msk.bf16.mxu1 %vm1799_vm5, %v1930_v56 }
0x1782   :  { %2737 = vmatmul.mubr.msk.bf16.gmra.mxu1 %vm1799_vm5, %v1931_v38 }
0x1783   :  { %2775 = vmatprep.mubr.msk.f32.mxu1 %vm3033_vm2, %v3032_v10 }
0x17d2   :  { %v2734_v55 = vpop.f32.mrf.mxu1 }
0x17d3   :  { %v1998_v7 = vadd.f32 %v2734_v55, %v2436_v47 }
0x17d4   :  { %v1989_v42 = vpop.f32.mrf.mxu1 }
0x17d5   :  { %v2322_v43 = vmul.f32 %v1998_v7, %v1713_v18  ;;  %v1990_v61 = vadd.f32 %v2436_v47, %v1989_v42 }
0x17d6   :  { %v2735_v25 = vpop.f32.mrf.mxu1 }
0x17d7   :  { %v2330_v36 = vadd.f32 %v2322_v43, %v3649_v21  ;;  %v2320_v40 = vmul.f32 %v1990_v61, %v1711_v11  ;;  %v2001_v49 = vadd.f32 %v2735_v25, %v2436_v47  ;;  %v2021_v56 = vsub.f32 %v1990_v61, %v3639_v15 }
0x17d8   :  { %v1992_v6 = vpop.f32.mrf.mxu1 }
0x17d9   :  { %2338 = vst.msk [vmem:[%s4015_s19 + $0x10] sm:$0xff] %vm1799_vm5, %v2330_v36  ;;  %v2328_v29 = vadd.f32 %v2320_v40, %v3666_v28  ;;  %v1993_v37 = vadd.f32 %v2436_v47, %v1992_v6  ;;  %v2323_v18 = vmul.f32 %v2001_v49, %v1714_v19  ;;  %v3909_v19 = vld [vmem:[%s4030_s21] sm:$0xff]  ;;  %v2029_v55 = vmul.f32 %v2021_v56, %v2021_v56 }
0x17da   :  { %2776 = vmatmul.mubr.msk.f32.vlgmr.msra.gmra.mxu1 %vm1625_vm4, %v3909_v19 }
0x17db   :  { %2336 = vst.msk [vmem:[%s4015_s19] sm:$0xff] %vm1799_vm5, %v2328_v29  ;;  %v2321_v11 = vmul.f32 %v1993_v37, %v1712_v23  ;;  %v2331_v21 = vadd.f32 %v2323_v18, %v3661_v44  ;;  %v2037_v15 = vmul.f32 %v2029_v55, %v3603_v52 }
0x17dd   :  { %v2329_v31 = vadd.f32 %v2321_v11, %v3676_v34  ;;  %2339 = vst.msk [vmem:[%s4015_s19 + $0x18] sm:$0xff] %vm1799_vm5, %v2331_v21 }
0x17df   :  { %2337 = vst.msk [vmem:[%s4015_s19 + $0x8] sm:$0xff] %vm1799_vm5, %v2329_v31 }
0x1842   :  { %v2738_v23 = vpop.f32.mrf.mxu1 }
0x1843   :  { %v2014_v44 = vadd.f32 %v2738_v23, %v2436_v47 }
0x1844   :  { %v2005_v28 = vpop.f32.mrf.mxu1 }
0x1845   :  { %v2326_v34 = vmul.f32 %v2014_v44, %v1717_v58  ;;  %v2006_v22 = vadd.f32 %v2436_v47, %v2005_v28  ;;  %v2027_v3 = vsub.f32 %v2014_v44, %v3726_v8 }
0x1846   :  { %v2739_v59 = vpop.f32.mrf.mxu1 }
0x1847   :  { %v2334_v9 = vadd.f32 %v2326_v34, %v3751_v13  ;;  %v2324_v0 = vmul.f32 %v2006_v22, %v1715_v62  ;;  %v2017_v57 = vadd.f32 %v2739_v59, %v2436_v47  ;;  %v2035_v27 = vmul.f32 %v2027_v3, %v2027_v3 }
0x1848   :  { %v2008_v51 = vpop.f32.mrf.mxu1  ;;  %v2025_v50 = vsub.f32 %v2006_v22, %v3740_v63  ;;  %v2023_v63 = vsub.f32 %v1998_v7, %v3613_v5 }
0x1849   :  { %2342 = vst.msk [vmem:[%s4015_s19 + $0x30] sm:$0xff] %vm1799_vm5, %v2334_v9  ;;  %v2332_v16 = vadd.f32 %v2324_v0, %v3765_v17  ;;  %v2009_v24 = vadd.f32 %v2436_v47, %v2008_v51  ;;  %v2028_v58 = vsub.f32 %v2017_v57, %v3735_v46  ;;  %v2327_v13 = vmul.f32 %v2017_v57, %v1718_v26 }
0x184a   :  { %v2024_v26 = vsub.f32 %v2001_v49, %v3631_v12  ;;  %v2031_v39 = vmul.f32 %v2023_v63, %v2023_v63 }
0x184b   :  { %2340 = vst.msk [vmem:[%s4015_s19 + $0x20] sm:$0xff] %vm1799_vm5, %v2332_v16  ;;  %v2026_v8 = vsub.f32 %v2009_v24, %v3746_v1  ;;  %v2325_v62 = vmul.f32 %v2009_v24, %v1716_v2  ;;  %v2036_v17 = vmul.f32 %v2028_v58, %v2028_v58  ;;  %v2335_v30 = vadd.f32 %v2327_v13, %v3761_v54 }
0x184c   :  { %v2043_v2 = vmul.f32 %v2035_v27, %v3702_v32  ;;  %v2033_v54 = vmul.f32 %v2025_v50, %v2025_v50  ;;  %v2032_v12 = vmul.f32 %v2024_v26, %v2024_v26 }
0x184d   :  { %v2333_v46 = vadd.f32 %v2325_v62, %v3775_v14  ;;  %v2044_v4 = vmul.f32 %v2036_v17, %v3712_v33  ;;  %2343 = vst.msk [vmem:[%s4015_s19 + $0x38] sm:$0xff] %vm1799_vm5, %v2335_v30  ;;  %v2034_v1 = vmul.f32 %v2026_v8, %v2026_v8  ;;  %v2022_v14 = vsub.f32 %v1993_v37, %v3645_v20 }
0x184e   :  { %v2041_v38 = vmul.f32 %v2033_v54, %v3707_v41  ;;  %v2040_v5 = vmul.f32 %v2032_v12, %v3608_v48  ;;  %v2039_v20 = vmul.f32 %v2031_v39, %v3593_v45 }
0x184f   :  { %2341 = vst.msk [vmem:[%s4015_s19 + $0x28] sm:$0xff] %vm1799_vm5, %v2333_v46  ;;  %2741 = vmatpush3.msra.mxu0 %v2044_v4  ;;  %v2042_v35 = vmul.f32 %v2034_v1, %v3721_v60  ;;  %v2030_v47 = vmul.f32 %v2022_v14, %v2022_v14  ;;  %s3039_s19 = smov [#allocation2]  }
0x1850   :  { %2742 = vmatprep.subr.mxu0 %v3032_v10  ;;  %s2352_s8 = sshll.u32 %s3039_s19, 4  ;;  %s2353_s8 = int_to_ptr.vmem [resolvable:$true] %s2352_s8 }
0x1851   :  { %2743 = vmatpush3.msra.mxu0 %v2043_v2  ;;  %v2038_v7 = vmul.f32 %v2030_v47, %v3622_v53  ;;  %s3010_s12 = scalar_lea.vmem %s2353_s8, 16  ;;  %s3014_s1 = scalar_lea.vmem %s2353_s8, 32 }
0x1852   :  { %2744 = vmatprep.subr.mxu0 %v3032_v10  ;;  %p3011_p0 = scmp.ne.s32.totalorder %s2353_s8, %s3010_s12  ;;  %p3015_p1 = scmp.lt.s32.totalorder %s2353_s8, %s2353_s8 }
0x1853   :  { %2745 = vmatpush3.msra.mxu0 %v2042_v35  ;;  %p3016_p2 = scmp.lt.s32.totalorder %s3014_s1, %s3010_s12 }
0x1854   :  { %2746 = vmatprep.subr.mxu0 %v3032_v10 }
0x1855   :  { %2747 = vmatpush3.msra.mxu0 %v2041_v38  ;;  %p3017_p3 = por %p3016_p2, %p3015_p1 }
0x1856   :  { %2748 = vmatprep.subr.mxu0 %v3032_v10 }
0x1857   :  { %2749 = vmatpush3.msra.mxu0 %v2040_v5  ;;  %p3018_p4 = pnand %p3017_p3, %p3011_p0 }
0x1858   :  { %2750 = vmatprep.subr.mxu0 %v3032_v10 }
0x1859   :  { %2751 = vmatpush3.msra.mxu0 %v2039_v20 }
0x185a   :  { %2752 = vmatprep.subr.mxu0 %v3032_v10 }
0x185b   :  { %2753 = vmatpush3.msra.mxu0 %v2038_v7 }
0x185c   :  { %2754 = vmatprep.subr.mxu0 %v3032_v10 }
0x185d   :  { %2755 = vmatpush3.msra.mxu0 %v2037_v15 }
0x185e   :  { %2757 = vmatmul.mubr.msk.f32.vlgmr.msra.gmra.mxu0 %vm1625_vm4, %v3909_v19  ;;  %2778 = vmatprep.subr.mxu0 %v3032_v10 }
0x185f   :  { %2779 = vmatpush3.msra.mxu0 %v3712_v33  ;;  %2794 = vmatprep.mubr.msk.f32.mxu0 %vm3033_vm2, %v3032_v10 }
0x1860   :  { %2780 = vmatprep.subr.mxu0 %v3032_v10 }
0x1861   :  { %2781 = vmatpush3.msra.mxu0 %v3702_v32 }
0x1862   :  { %2782 = vmatprep.subr.mxu0 %v3032_v10 }
0x1863   :  { %2783 = vmatpush3.msra.mxu0 %v3721_v60 }
0x1864   :  { %2784 = vmatprep.subr.mxu0 %v3032_v10 }
0x1865   :  { %2785 = vmatpush3.msra.mxu0 %v3707_v41 }
0x1866   :  { %2786 = vmatprep.subr.mxu0 %v3032_v10 }
0x1867   :  { %2787 = vmatpush3.msra.mxu0 %v3608_v48 }
0x1868   :  { %2788 = vmatprep.subr.mxu0 %v3032_v10 }
0x1869   :  { %2789 = vmatpush3.msra.mxu0 %v3593_v45 }
0x186a   :  { %2790 = vmatprep.subr.mxu0 %v3032_v10 }
0x186b   :  { %2791 = vmatpush3.msra.mxu0 %v3622_v53 }
0x186c   :  { %2792 = vmatprep.subr.mxu0 %v3032_v10 }
0x186d   :  { %2793 = vmatpush3.msra.mxu0 %v3603_v52 }
0x186e   :  { %2795 = vmatmul.mubr.msk.f32.vlgmr.msra.gmra.mxu0 %vm1625_vm4, %v3909_v19 }
0x189a   :  { %v2211_v32 = vpop.f32.mrf.mxu1 }
0x189b   :  { %v2215_v53 = vsel %vm1799_vm5, %v2211_v32, 0.0 }
0x189c   :  { %v2777_v41 = vpop.f32.mrf.mxu1 }
0x191e   :  { %v2138_v33 = vpop.f32.mrf.mxu0 }
0x191f   :  { %v2142_v48 = vsel %vm1799_vm5, %v2138_v33, 0.0 }
0x1920   :  { %v2758_v60 = vpop.f32.mrf.mxu0  ;;  %2143 = vadd.xlane.f32.xlu1 %v2142_v48 }
0x192e   :  { %v2284_v42 = vpop.f32.mrf.mxu0 }
0x192f   :  { %v2288_v45 = vsel %vm1799_vm5, %v2284_v42, 0.0 }
0x1930   :  { %2289 = vadd.xlane.f32.xlu0 %v2288_v45  ;;  %v2796_v43 = vpop.f32.mrf.mxu0 }
0x1934   :  { %2216 = vadd.xlane.f32.xlu0 %v2215_v53 }
0x19a9   :  { %v2144_v36 = vpop.xlane.xlu1 %2143 }
0x19b9   :  { %v2290_v10 = vpop.xlane.xlu0 %2289 }
0x19ba   :  { %v2291_v52 = vadd.f32 1e-12, %v2290_v10 }
0x19bc   :  { %3003 = vrcp.f32 %v2291_v52 }
0x19bd   :  { %v2217_v61 = vpop.xlane.xlu0 %2216 }
0x19c9   :  { %v3004_v25 = vpop.eup %3003 }
0x19ca   :  { %v2293_v40 = vmul.f32 %v3004_v25, %v2144_v36  ;;  %v2301_v49 = vmul.f32 %v3004_v25, %v2217_v61 }
0x19cc   :  { %3005 = vrsqrt.f32 %v2301_v49  ;;  %vm2304_vm7 = vcmp.eq.f32.partialorder %v2301_v49, inf  ;;  %v2307_v11 = vand.u32 2147483648, %v2301_v49  ;;  %vm2296_vm8 = vcmp.eq.f32.partialorder %v2293_v40, inf }
0x19cd   :  { %3007 = vrsqrt.f32 %v2293_v40  ;;  %v2299_v21 = vand.u32 2147483648, %v2293_v40  ;;  %vm2306_vm9 = vcmp.eq.f32.partialorder %v2301_v49, 0.0  ;;  %vm2298_vm10 = vcmp.eq.f32.partialorder %v2293_v40, 0.0 }
0x19d9   :  { %v3006_v6 = vpop.eup %3005 }
0x19da   :  { %v3008_v29 = vpop.eup %3007  ;;  %v2303_v37 = vmul.f32 %v3006_v6, %v2301_v49 }
0x19db   :  { %v2295_v18 = vmul.f32 %v3008_v29, %v2293_v40 }
0x19dc   :  { %v2305_v31 = vsel %vm2304_vm7, %v2301_v49, %v2303_v37 }
0x19dd   :  { %v2297_v19 = vsel %vm2296_vm8, %v2293_v40, %v2295_v18  ;;  %v2308_v23 = vsel %vm2306_vm9, %v2307_v11, %v2305_v31 }
0x19de   :  { %v2300_v44 = vsel %vm2298_vm10, %v2299_v21, %v2297_v19 }
0x19df   :  { %v2309_v28 = vadd.f32 %v2308_v23, %v2300_v44 }
0x19e1   :  { %v2310_v34 = vrot.slane %v2309_v28, 4 }
0x19e3   :  { %v2311_v22 = vadd.f32 %v2310_v34, %v2309_v28 }
0x19e5   :  { %v2312_v59 = vrot.slane %v2311_v22, 2 }
0x19e7   :  { %v2313_v9 = vadd.f32 %v2312_v59, %v2311_v22 }
0x19e9   :  { %v2314_v0 = vrot.slane %v2313_v9, 1 }
0x19eb   :  { %v2315_v3 = vadd.f32 %v2314_v0, %v2313_v9 }
0x19ed   :  { %v2317_v57 = vmul.f32 0.125, %v2315_v3 }
0x19ef   :  { %2319 = vst.msk [vmem:[#allocation2] sm:$0x1] %vm2318_vm11, %v2317_v57 }
0x19f0   :  { %3021 = shalt.err (!%p3018_p4)
}
0x19f1   :  { %2355 = dma.vmem_to_hbm [thread:$0]  %s2353_s8, 16, %s4016_s20, [#allocation3]  }
0x19f2   :  { %3030 = dma.done.wait [#allocation3], 16  }
0x19f3   :  { %3031 = vsyncadd [#allocation3], 4294967280 }
0x19f4   :  { %2361 = vsyncpa [#allocation3], 1 }

</bundles_post_ra>
